<compile_context>
chip_gen: v7x
topology: tpu7x:2x2x1
jax: 0.10.0
libtpu: 0.0.40
codegen_flags: <defaults>
</compile_context>

<pallas_src>
import math

import jax
import jax.numpy as jnp
from jax.experimental import pallas as pl
from jax.experimental.pallas import tpu as pltpu


# ----------------------------- config (small, synthetic) ---------------------
BATCH = 2
SEQ = 8            # input_size
HIDDEN = 32        # config.hidden_size
NUM_HEADS = 4
HEAD_DIM = HIDDEN // NUM_HEADS
INTERMEDIATE = 64
NUM_LAYERS = 2
LN_EPS = 1e-12     # BERT LayerNorm eps


# ----------------------------- in-kernel helpers ------------------------------

def _layernorm(h, g, b):
    mu = jnp.mean(h, axis=-1, keepdims=True)
    var = jnp.mean((h - mu) ** 2, axis=-1, keepdims=True)
    return (h - mu) * jax.lax.rsqrt(var + LN_EPS) * g + b


def _gelu_exact(x):
    # exact (erf) GELU, as in BERT
    return 0.5 * x * (1.0 + jax.lax.erf(x * (1.0 / math.sqrt(2.0))))


# ----------------------------- fused Pallas kernel ----------------------------

def _tabnet_fused_kernel(x_ref, pe_ref, emb_w_ref, emb_b_ref,
                         qkv_w_ref, qkv_b_ref, ao_w_ref, ao_b_ref,
                         ln1_g_ref, ln1_b_ref, i_w_ref, i_b_ref,
                         o_w_ref, o_b_ref, ln2_g_ref, ln2_b_ref,
                         cls_w_ref, cls_b_ref, logits_ref):
    B, S, H, Dh = BATCH, SEQ, HIDDEN, HEAD_DIM
    M = B * S

    # --- embedding Linear(1, H): with K == 1 this is a broadcast multiply ----
    x = x_ref[...]                                      # (M, 1)
    emb = x * emb_w_ref[...] + emb_b_ref[...]           # (M, H)

    # --- scale + positional encoding (dropout = identity at inference) -------
    pe = jnp.concatenate([pe_ref[...]] * B, axis=0)     # (M, H), replicated in VMEM
    h = emb * math.sqrt(H) + pe

    scale = 1.0 / math.sqrt(Dh)
    for l in range(NUM_LAYERS):                         # static unroll; weights stay in VMEM
        # ---- fused QKV projection: one (M,H) x (H,3H) matmul ----------------
        qkv = jnp.dot(h, qkv_w_ref[l], preferred_element_type=jnp.float32) + qkv_b_ref[l]
        q = qkv[:, 0 * H:1 * H]
        k = qkv[:, 1 * H:2 * H]
        v = qkv[:, 2 * H:3 * H]

        # ---- multi-head self-attention over static (batch, head) tiles ------
        rows = []
        for b in range(B):
            r0 = b * S
            head_ctx = []
            for hh in range(NUM_HEADS):
                c0 = hh * Dh
                q_bh = q[r0:r0 + S, c0:c0 + Dh]
                k_bh = k[r0:r0 + S, c0:c0 + Dh]
                v_bh = v[r0:r0 + S, c0:c0 + Dh]
                s_bh = jnp.dot(q_bh, k_bh.T, preferred_element_type=jnp.float32) * scale
                s_bh = s_bh - jnp.max(s_bh, axis=-1, keepdims=True)
                p_bh = jnp.exp(s_bh)
                p_bh = p_bh / jnp.sum(p_bh, axis=-1, keepdims=True)
                head_ctx.append(jnp.dot(p_bh, v_bh, preferred_element_type=jnp.float32))
            rows.append(jnp.concatenate(head_ctx, axis=1))      # (S, H)
        ctx = jnp.concatenate(rows, axis=0)                     # (M, H)

        # ---- attention output proj + residual + LayerNorm (fused) -----------
        attn_out = jnp.dot(ctx, ao_w_ref[l],
                           preferred_element_type=jnp.float32) + ao_b_ref[l]
        h1 = _layernorm(attn_out + h, ln1_g_ref[l], ln1_b_ref[l])

        # ---- FFN: Linear -> GELU -> Linear + residual + LayerNorm (fused) ---
        inter = jnp.dot(h1, i_w_ref[l],
                        preferred_element_type=jnp.float32) + i_b_ref[l]
        inter = _gelu_exact(inter)
        ffn = jnp.dot(inter, o_w_ref[l],
                      preferred_element_type=jnp.float32) + o_b_ref[l]
        h = _layernorm(ffn + h1, ln2_g_ref[l], ln2_b_ref[l])

    # --- mean over seq (per batch) -> classifier Linear(H, 1) ---------------
    pooled = jnp.concatenate(
        [jnp.mean(h[b * S:(b + 1) * S, :], axis=0, keepdims=True) for b in range(B)],
        axis=0)                                                  # (B, H)
    logits_ref[...] = (jnp.dot(pooled, cls_w_ref[...],
                               preferred_element_type=jnp.float32)
                       + cls_b_ref[...])                         # (B, 1)


# ----------------------------- parameter setup --------------------------------

def _dense_params(key, fan_in, fan_out):
    kw, _ = jax.random.split(key)
    w = 0.02 * jax.random.normal(kw, (fan_in, fan_out), jnp.float32)
    b = jnp.zeros((1, fan_out), jnp.float32)
    return w, b


def make_positional_encoding(seq_len, dim):
    # Exactly reproduces PositionalEncoder.__init__ (including its (2i+1)/d cos exponent).
    pos = jnp.arange(seq_len, dtype=jnp.float32)[:, None]              # (S, 1)
    i_even = jnp.arange(0, dim, 2, dtype=jnp.float32)[None, :]          # even indices
    pe_sin = jnp.sin(pos / (10000.0 ** (2.0 * i_even / dim)))
    pe_cos = jnp.cos(pos / (10000.0 ** ((2.0 * i_even + 1.0) / dim)))
    pe = jnp.zeros((seq_len, dim), jnp.float32)
    pe = pe.at[:, 0::2].set(pe_sin)
    pe = pe.at[:, 1::2].set(pe_cos)
    return pe


def init_params(key):
    keys = jax.random.split(key, 3 + NUM_LAYERS)
    params = {}
    params["emb_w"], params["emb_b"] = _dense_params(keys[0], 1, HIDDEN)
    params["cls_w"], params["cls_b"] = _dense_params(keys[1], HIDDEN, 1)
    params["pe"] = make_positional_encoding(SEQ, HIDDEN)

    stk = {n: [] for n in ["qkv_w", "qkv_b", "ao_w", "ao_b", "ln1_g", "ln1_b",
                           "i_w", "i_b", "o_w", "o_b", "ln2_g", "ln2_b"]}
    for l in range(NUM_LAYERS):
        lk = jax.random.split(keys[3 + l], 6)
        qw, qb = _dense_params(lk[0], HIDDEN, HIDDEN)
        kw, kb = _dense_params(lk[1], HIDDEN, HIDDEN)
        vw, vb = _dense_params(lk[2], HIDDEN, HIDDEN)
        stk["qkv_w"].append(jnp.concatenate([qw, kw, vw], axis=1))      # (H, 3H)
        stk["qkv_b"].append(jnp.concatenate([qb, kb, vb], axis=1))      # (1, 3H)
        aw, ab = _dense_params(lk[3], HIDDEN, HIDDEN)
        stk["ao_w"].append(aw); stk["ao_b"].append(ab)
        iw, ib = _dense_params(lk[4], HIDDEN, INTERMEDIATE)
        stk["i_w"].append(iw); stk["i_b"].append(ib)
        ow, ob = _dense_params(lk[5], INTERMEDIATE, HIDDEN)
        stk["o_w"].append(ow); stk["o_b"].append(ob)
        stk["ln1_g"].append(jnp.ones((1, HIDDEN), jnp.float32))
        stk["ln1_b"].append(jnp.zeros((1, HIDDEN), jnp.float32))
        stk["ln2_g"].append(jnp.ones((1, HIDDEN), jnp.float32))
        stk["ln2_b"].append(jnp.zeros((1, HIDDEN), jnp.float32))
    for name, vals in stk.items():
        params[name] = jnp.stack(vals, axis=0)       # leading layer axis
    return params


# ----------------------------- forward pass -----------------------------------

def tabnet_forward(x, params, labels=None):
    """x: (B, SEQ, 1) float32  ->  (loss, logits) with logits: (B, 1)."""
    B, S, _ = x.shape
    x_flat = x.reshape(B * S, 1)

    args = (x_flat, params["pe"], params["emb_w"], params["emb_b"],
            params["qkv_w"], params["qkv_b"], params["ao_w"], params["ao_b"],
            params["ln1_g"], params["ln1_b"], params["i_w"], params["i_b"],
            params["o_w"], params["o_b"], params["ln2_g"], params["ln2_b"],
            params["cls_w"], params["cls_b"])

    M = B * S
    flops_layer = (2 * M * HIDDEN * 3 * HIDDEN                     # fused QKV
                   + 2 * 2 * B * NUM_HEADS * S * S * HEAD_DIM      # qk^T and pv
                   + 2 * M * HIDDEN * HIDDEN                       # attn out proj
                   + 4 * M * HIDDEN * INTERMEDIATE)                # FFN (2 matmuls)
    cost = pl.CostEstimate(
        flops=NUM_LAYERS * flops_layer + 2 * M * HIDDEN + 2 * B * HIDDEN,
        transcendentals=NUM_LAYERS * (B * NUM_HEADS * S * S + M * INTERMEDIATE),
        bytes_accessed=sum(int(a.size) * a.dtype.itemsize for a in args) + B * 4,
    )

    vmem_spec = pl.BlockSpec(memory_space=pltpu.MemorySpace.VMEM)
    logits = pl.pallas_call(
        _tabnet_fused_kernel,
        out_shape=jax.ShapeDtypeStruct((B, 1), jnp.float32),
        in_specs=[vmem_spec] * len(args),
        out_specs=vmem_spec,
        cost_estimate=cost,
        compiler_params=pltpu.CompilerParams(vmem_limit_bytes=8 * 1024 * 1024),
    )(*args)

    loss = None
    if labels is not None:
        # TODO(synk): BCEWithLogitsLoss path not exercised (labels=None in this test)
        z = logits.reshape(-1)
        y = labels.reshape(-1)
        loss = jnp.mean(jnp.maximum(z, 0) - z * y + jnp.log1p(jnp.exp(-jnp.abs(z))))
    return loss, logits


# ----------------------------- main --------------------------------------------

if __name__ == "__main__":
    key = jax.random.PRNGKey(0)
    k_x, k_p = jax.random.split(key)
    x = jax.random.normal(k_x, (BATCH, SEQ, 1), jnp.float32)
    params = init_params(k_p)

    loss, logits = tabnet_forward(x, params, labels=None)
    jax.block_until_ready(logits)
    assert logits.shape == (BATCH, 1) and loss is None
    print("KERNEL_OK")
</pallas_src>

<mosaic_0001>
module attributes {stable_mosaic.version = 11 : i64} {
  func.func @_tabnet_fused_kernel(%arg0: memref<16x1xf32, #tpu.memory_space<vmem>>, %arg1: memref<8x32xf32, #tpu.memory_space<vmem>>, %arg2: memref<1x32xf32, #tpu.memory_space<vmem>>, %arg3: memref<1x32xf32, #tpu.memory_space<vmem>>, %arg4: memref<2x32x96xf32, #tpu.memory_space<vmem>>, %arg5: memref<2x1x96xf32, #tpu.memory_space<vmem>>, %arg6: memref<2x32x32xf32, #tpu.memory_space<vmem>>, %arg7: memref<2x1x32xf32, #tpu.memory_space<vmem>>, %arg8: memref<2x1x32xf32, #tpu.memory_space<vmem>>, %arg9: memref<2x1x32xf32, #tpu.memory_space<vmem>>, %arg10: memref<2x32x64xf32, #tpu.memory_space<vmem>>, %arg11: memref<2x1x64xf32, #tpu.memory_space<vmem>>, %arg12: memref<2x64x32xf32, #tpu.memory_space<vmem>>, %arg13: memref<2x1x32xf32, #tpu.memory_space<vmem>>, %arg14: memref<2x1x32xf32, #tpu.memory_space<vmem>>, %arg15: memref<2x1x32xf32, #tpu.memory_space<vmem>>, %arg16: memref<32x1xf32, #tpu.memory_space<vmem>>, %arg17: memref<1x1xf32, #tpu.memory_space<vmem>>, %arg18: memref<2x1xf32, #tpu.memory_space<vmem>>) attributes {dimension_semantics = [], scalar_prefetch = 0 : i64, scratch_operands = 0 : i64, tpu.core_type = #tpu.core_type<tc>} {
    %c0 = arith.constant 0 : index
    %c0_0 = arith.constant 0 : index
    %0 = vector.load %arg0[%c0, %c0_0] : memref<16x1xf32, #tpu.memory_space<vmem>>, vector<16x1xf32>
    %c0_1 = arith.constant 0 : index
    %c0_2 = arith.constant 0 : index
    %1 = vector.load %arg2[%c0_1, %c0_2] : memref<1x32xf32, #tpu.memory_space<vmem>>, vector<1x32xf32>
    %2 = vector.broadcast %0 : vector<16x1xf32> to vector<16x32xf32>
    %3 = vector.broadcast %1 : vector<1x32xf32> to vector<16x32xf32>
    %4 = arith.mulf %2, %3 : vector<16x32xf32>
    %c0_3 = arith.constant 0 : index
    %c0_4 = arith.constant 0 : index
    %5 = vector.load %arg3[%c0_3, %c0_4] : memref<1x32xf32, #tpu.memory_space<vmem>>, vector<1x32xf32>
    %6 = vector.broadcast %5 : vector<1x32xf32> to vector<16x32xf32>
    %7 = arith.addf %4, %6 : vector<16x32xf32>
    %c0_5 = arith.constant 0 : index
    %c0_6 = arith.constant 0 : index
    %8 = vector.load %arg1[%c0_5, %c0_6] : memref<8x32xf32, #tpu.memory_space<vmem>>, vector<8x32xf32>
    %9 = tpu.concatenate %8, %8 in 0 : vector<8x32xf32>, vector<8x32xf32> -> vector<16x32xf32>
    %cst = arith.constant 5.65685415 : f32
    %10 = vector.broadcast %cst : f32 to vector<16x32xf32>
    %11 = arith.mulf %7, %10 : vector<16x32xf32>
    %12 = arith.addf %11, %9 : vector<16x32xf32>
    %c0_7 = arith.constant 0 : index
    %c0_8 = arith.constant 0 : index
    %c0_9 = arith.constant 0 : index
    %13 = vector.load %arg4[%c0_7, %c0_8, %c0_9] : memref<2x32x96xf32, #tpu.memory_space<vmem>>, vector<1x32x96xf32>
    %14 = vector.shape_cast %13 : vector<1x32x96xf32> to vector<32x96xf32>
    %cst_10 = arith.constant dense<0.000000e+00> : vector<16x96xf32>
    %15 = tpu.matmul %12, %14, %cst_10 {dimension_numbers = #tpu.dot_dimension_numbers<[1], [0], [0], [1], [0, 0, 1, 1], [], []>} : vector<16x32xf32>, vector<32x96xf32>, vector<16x96xf32> -> vector<16x96xf32>
    %c0_11 = arith.constant 0 : index
    %c0_12 = arith.constant 0 : index
    %c0_13 = arith.constant 0 : index
    %16 = vector.load %arg5[%c0_11, %c0_12, %c0_13] : memref<2x1x96xf32, #tpu.memory_space<vmem>>, vector<1x1x96xf32>
    %17 = vector.shape_cast %16 : vector<1x1x96xf32> to vector<1x96xf32>
    %18 = vector.broadcast %17 : vector<1x96xf32> to vector<16x96xf32>
    %19 = arith.addf %15, %18 : vector<16x96xf32>
    %20 = vector.extract_strided_slice %19 {offsets = [0, 0], sizes = [16, 32], strides = [1, 1]} : vector<16x96xf32> to vector<16x32xf32>
    %21 = vector.extract_strided_slice %19 {offsets = [0, 32], sizes = [16, 32], strides = [1, 1]} : vector<16x96xf32> to vector<16x32xf32>
    %22 = vector.extract_strided_slice %19 {offsets = [0, 64], sizes = [16, 32], strides = [1, 1]} : vector<16x96xf32> to vector<16x32xf32>
    %23 = vector.extract_strided_slice %20 {offsets = [0, 0], sizes = [8, 8], strides = [1, 1]} : vector<16x32xf32> to vector<8x8xf32>
    %24 = vector.extract_strided_slice %21 {offsets = [0, 0], sizes = [8, 8], strides = [1, 1]} : vector<16x32xf32> to vector<8x8xf32>
    %25 = vector.extract_strided_slice %22 {offsets = [0, 0], sizes = [8, 8], strides = [1, 1]} : vector<16x32xf32> to vector<8x8xf32>
    %26 = tpu.transpose %24, [1, 0] : vector<8x8xf32> -> vector<8x8xf32>
    %cst_14 = arith.constant dense<0.000000e+00> : vector<8x8xf32>
    %27 = tpu.matmul %23, %26, %cst_14 {dimension_numbers = #tpu.dot_dimension_numbers<[1], [0], [0], [1], [0, 0, 1, 1], [], []>} : vector<8x8xf32>, vector<8x8xf32>, vector<8x8xf32> -> vector<8x8xf32>
    %cst_15 = arith.constant 0.353553385 : f32
    %28 = vector.broadcast %cst_15 : f32 to vector<8x8xf32>
    %29 = arith.mulf %27, %28 : vector<8x8xf32>
    %cst_16 = arith.constant dense<0xFF800000> : vector<8xf32>
    %30 = vector.multi_reduction <maximumf>, %29, %cst_16 [1] : vector<8x8xf32> to vector<8xf32>
    %31 = vector.shape_cast %30 : vector<8xf32> to vector<8x1xf32>
    %32 = vector.broadcast %31 : vector<8x1xf32> to vector<8x8xf32>
    %33 = arith.subf %29, %32 : vector<8x8xf32>
    %34 = math.exp %33 : vector<8x8xf32>
    %cst_17 = arith.constant dense<0.000000e+00> : vector<8xf32>
    %35 = vector.multi_reduction <add>, %34, %cst_17 [1] : vector<8x8xf32> to vector<8xf32>
    %36 = vector.shape_cast %35 : vector<8xf32> to vector<8x1xf32>
    %37 = vector.broadcast %36 : vector<8x1xf32> to vector<8x8xf32>
    %38 = arith.divf %34, %37 : vector<8x8xf32>
    %cst_18 = arith.constant dense<0.000000e+00> : vector<8x8xf32>
    %39 = tpu.matmul %38, %25, %cst_18 {dimension_numbers = #tpu.dot_dimension_numbers<[1], [0], [0], [1], [0, 0, 1, 1], [], []>} : vector<8x8xf32>, vector<8x8xf32>, vector<8x8xf32> -> vector<8x8xf32>
    %40 = vector.extract_strided_slice %20 {offsets = [0, 8], sizes = [8, 8], strides = [1, 1]} : vector<16x32xf32> to vector<8x8xf32>
    %41 = vector.extract_strided_slice %21 {offsets = [0, 8], sizes = [8, 8], strides = [1, 1]} : vector<16x32xf32> to vector<8x8xf32>
    %42 = vector.extract_strided_slice %22 {offsets = [0, 8], sizes = [8, 8], strides = [1, 1]} : vector<16x32xf32> to vector<8x8xf32>
    %43 = tpu.transpose %41, [1, 0] : vector<8x8xf32> -> vector<8x8xf32>
    %cst_19 = arith.constant dense<0.000000e+00> : vector<8x8xf32>
    %44 = tpu.matmul %40, %43, %cst_19 {dimension_numbers = #tpu.dot_dimension_numbers<[1], [0], [0], [1], [0, 0, 1, 1], [], []>} : vector<8x8xf32>, vector<8x8xf32>, vector<8x8xf32> -> vector<8x8xf32>
    %cst_20 = arith.constant 0.353553385 : f32
    %45 = vector.broadcast %cst_20 : f32 to vector<8x8xf32>
    %46 = arith.mulf %44, %45 : vector<8x8xf32>
    %cst_21 = arith.constant dense<0xFF800000> : vector<8xf32>
    %47 = vector.multi_reduction <maximumf>, %46, %cst_21 [1] : vector<8x8xf32> to vector<8xf32>
    %48 = vector.shape_cast %47 : vector<8xf32> to vector<8x1xf32>
    %49 = vector.broadcast %48 : vector<8x1xf32> to vector<8x8xf32>
    %50 = arith.subf %46, %49 : vector<8x8xf32>
    %51 = math.exp %50 : vector<8x8xf32>
    %cst_22 = arith.constant dense<0.000000e+00> : vector<8xf32>
    %52 = vector.multi_reduction <add>, %51, %cst_22 [1] : vector<8x8xf32> to vector<8xf32>
    %53 = vector.shape_cast %52 : vector<8xf32> to vector<8x1xf32>
    %54 = vector.broadcast %53 : vector<8x1xf32> to vector<8x8xf32>
    %55 = arith.divf %51, %54 : vector<8x8xf32>
    %cst_23 = arith.constant dense<0.000000e+00> : vector<8x8xf32>
    %56 = tpu.matmul %55, %42, %cst_23 {dimension_numbers = #tpu.dot_dimension_numbers<[1], [0], [0], [1], [0, 0, 1, 1], [], []>} : vector<8x8xf32>, vector<8x8xf32>, vector<8x8xf32> -> vector<8x8xf32>
    %57 = vector.extract_strided_slice %20 {offsets = [0, 16], sizes = [8, 8], strides = [1, 1]} : vector<16x32xf32> to vector<8x8xf32>
    %58 = vector.extract_strided_slice %21 {offsets = [0, 16], sizes = [8, 8], strides = [1, 1]} : vector<16x32xf32> to vector<8x8xf32>
    %59 = vector.extract_strided_slice %22 {offsets = [0, 16], sizes = [8, 8], strides = [1, 1]} : vector<16x32xf32> to vector<8x8xf32>
    %60 = tpu.transpose %58, [1, 0] : vector<8x8xf32> -> vector<8x8xf32>
    %cst_24 = arith.constant dense<0.000000e+00> : vector<8x8xf32>
    %61 = tpu.matmul %57, %60, %cst_24 {dimension_numbers = #tpu.dot_dimension_numbers<[1], [0], [0], [1], [0, 0, 1, 1], [], []>} : vector<8x8xf32>, vector<8x8xf32>, vector<8x8xf32> -> vector<8x8xf32>
    %cst_25 = arith.constant 0.353553385 : f32
    %62 = vector.broadcast %cst_25 : f32 to vector<8x8xf32>
    %63 = arith.mulf %61, %62 : vector<8x8xf32>
    %cst_26 = arith.constant dense<0xFF800000> : vector<8xf32>
    %64 = vector.multi_reduction <maximumf>, %63, %cst_26 [1] : vector<8x8xf32> to vector<8xf32>
    %65 = vector.shape_cast %64 : vector<8xf32> to vector<8x1xf32>
    %66 = vector.broadcast %65 : vector<8x1xf32> to vector<8x8xf32>
    %67 = arith.subf %63, %66 : vector<8x8xf32>
    %68 = math.exp %67 : vector<8x8xf32>
    %cst_27 = arith.constant dense<0.000000e+00> : vector<8xf32>
    %69 = vector.multi_reduction <add>, %68, %cst_27 [1] : vector<8x8xf32> to vector<8xf32>
    %70 = vector.shape_cast %69 : vector<8xf32> to vector<8x1xf32>
    %71 = vector.broadcast %70 : vector<8x1xf32> to vector<8x8xf32>
    %72 = arith.divf %68, %71 : vector<8x8xf32>
    %cst_28 = arith.constant dense<0.000000e+00> : vector<8x8xf32>
    %73 = tpu.matmul %72, %59, %cst_28 {dimension_numbers = #tpu.dot_dimension_numbers<[1], [0], [0], [1], [0, 0, 1, 1], [], []>} : vector<8x8xf32>, vector<8x8xf32>, vector<8x8xf32> -> vector<8x8xf32>
    %74 = vector.extract_strided_slice %20 {offsets = [0, 24], sizes = [8, 8], strides = [1, 1]} : vector<16x32xf32> to vector<8x8xf32>
    %75 = vector.extract_strided_slice %21 {offsets = [0, 24], sizes = [8, 8], strides = [1, 1]} : vector<16x32xf32> to vector<8x8xf32>
    %76 = vector.extract_strided_slice %22 {offsets = [0, 24], sizes = [8, 8], strides = [1, 1]} : vector<16x32xf32> to vector<8x8xf32>
    %77 = tpu.transpose %75, [1, 0] : vector<8x8xf32> -> vector<8x8xf32>
    %cst_29 = arith.constant dense<0.000000e+00> : vector<8x8xf32>
    %78 = tpu.matmul %74, %77, %cst_29 {dimension_numbers = #tpu.dot_dimension_numbers<[1], [0], [0], [1], [0, 0, 1, 1], [], []>} : vector<8x8xf32>, vector<8x8xf32>, vector<8x8xf32> -> vector<8x8xf32>
    %cst_30 = arith.constant 0.353553385 : f32
    %79 = vector.broadcast %cst_30 : f32 to vector<8x8xf32>
    %80 = arith.mulf %78, %79 : vector<8x8xf32>
    %cst_31 = arith.constant dense<0xFF800000> : vector<8xf32>
    %81 = vector.multi_reduction <maximumf>, %80, %cst_31 [1] : vector<8x8xf32> to vector<8xf32>
    %82 = vector.shape_cast %81 : vector<8xf32> to vector<8x1xf32>
    %83 = vector.broadcast %82 : vector<8x1xf32> to vector<8x8xf32>
    %84 = arith.subf %80, %83 : vector<8x8xf32>
    %85 = math.exp %84 : vector<8x8xf32>
    %cst_32 = arith.constant dense<0.000000e+00> : vector<8xf32>
    %86 = vector.multi_reduction <add>, %85, %cst_32 [1] : vector<8x8xf32> to vector<8xf32>
    %87 = vector.shape_cast %86 : vector<8xf32> to vector<8x1xf32>
    %88 = vector.broadcast %87 : vector<8x1xf32> to vector<8x8xf32>
    %89 = arith.divf %85, %88 : vector<8x8xf32>
    %cst_33 = arith.constant dense<0.000000e+00> : vector<8x8xf32>
    %90 = tpu.matmul %89, %76, %cst_33 {dimension_numbers = #tpu.dot_dimension_numbers<[1], [0], [0], [1], [0, 0, 1, 1], [], []>} : vector<8x8xf32>, vector<8x8xf32>, vector<8x8xf32> -> vector<8x8xf32>
    %91 = tpu.concatenate %39, %56, %73, %90 in 1 : vector<8x8xf32>, vector<8x8xf32>, vector<8x8xf32>, vector<8x8xf32> -> vector<8x32xf32>
    %92 = vector.extract_strided_slice %20 {offsets = [8, 0], sizes = [8, 8], strides = [1, 1]} : vector<16x32xf32> to vector<8x8xf32>
    %93 = vector.extract_strided_slice %21 {offsets = [8, 0], sizes = [8, 8], strides = [1, 1]} : vector<16x32xf32> to vector<8x8xf32>
    %94 = vector.extract_strided_slice %22 {offsets = [8, 0], sizes = [8, 8], strides = [1, 1]} : vector<16x32xf32> to vector<8x8xf32>
    %95 = tpu.transpose %93, [1, 0] : vector<8x8xf32> -> vector<8x8xf32>
    %cst_34 = arith.constant dense<0.000000e+00> : vector<8x8xf32>
    %96 = tpu.matmul %92, %95, %cst_34 {dimension_numbers = #tpu.dot_dimension_numbers<[1], [0], [0], [1], [0, 0, 1, 1], [], []>} : vector<8x8xf32>, vector<8x8xf32>, vector<8x8xf32> -> vector<8x8xf32>
    %cst_35 = arith.constant 0.353553385 : f32
    %97 = vector.broadcast %cst_35 : f32 to vector<8x8xf32>
    %98 = arith.mulf %96, %97 : vector<8x8xf32>
    %cst_36 = arith.constant dense<0xFF800000> : vector<8xf32>
    %99 = vector.multi_reduction <maximumf>, %98, %cst_36 [1] : vector<8x8xf32> to vector<8xf32>
    %100 = vector.shape_cast %99 : vector<8xf32> to vector<8x1xf32>
    %101 = vector.broadcast %100 : vector<8x1xf32> to vector<8x8xf32>
    %102 = arith.subf %98, %101 : vector<8x8xf32>
    %103 = math.exp %102 : vector<8x8xf32>
    %cst_37 = arith.constant dense<0.000000e+00> : vector<8xf32>
    %104 = vector.multi_reduction <add>, %103, %cst_37 [1] : vector<8x8xf32> to vector<8xf32>
    %105 = vector.shape_cast %104 : vector<8xf32> to vector<8x1xf32>
    %106 = vector.broadcast %105 : vector<8x1xf32> to vector<8x8xf32>
    %107 = arith.divf %103, %106 : vector<8x8xf32>
    %cst_38 = arith.constant dense<0.000000e+00> : vector<8x8xf32>
    %108 = tpu.matmul %107, %94, %cst_38 {dimension_numbers = #tpu.dot_dimension_numbers<[1], [0], [0], [1], [0, 0, 1, 1], [], []>} : vector<8x8xf32>, vector<8x8xf32>, vector<8x8xf32> -> vector<8x8xf32>
    %109 = vector.extract_strided_slice %20 {offsets = [8, 8], sizes = [8, 8], strides = [1, 1]} : vector<16x32xf32> to vector<8x8xf32>
    %110 = vector.extract_strided_slice %21 {offsets = [8, 8], sizes = [8, 8], strides = [1, 1]} : vector<16x32xf32> to vector<8x8xf32>
    %111 = vector.extract_strided_slice %22 {offsets = [8, 8], sizes = [8, 8], strides = [1, 1]} : vector<16x32xf32> to vector<8x8xf32>
    %112 = tpu.transpose %110, [1, 0] : vector<8x8xf32> -> vector<8x8xf32>
    %cst_39 = arith.constant dense<0.000000e+00> : vector<8x8xf32>
    %113 = tpu.matmul %109, %112, %cst_39 {dimension_numbers = #tpu.dot_dimension_numbers<[1], [0], [0], [1], [0, 0, 1, 1], [], []>} : vector<8x8xf32>, vector<8x8xf32>, vector<8x8xf32> -> vector<8x8xf32>
    %cst_40 = arith.constant 0.353553385 : f32
    %114 = vector.broadcast %cst_40 : f32 to vector<8x8xf32>
    %115 = arith.mulf %113, %114 : vector<8x8xf32>
    %cst_41 = arith.constant dense<0xFF800000> : vector<8xf32>
    %116 = vector.multi_reduction <maximumf>, %115, %cst_41 [1] : vector<8x8xf32> to vector<8xf32>
    %117 = vector.shape_cast %116 : vector<8xf32> to vector<8x1xf32>
    %118 = vector.broadcast %117 : vector<8x1xf32> to vector<8x8xf32>
    %119 = arith.subf %115, %118 : vector<8x8xf32>
    %120 = math.exp %119 : vector<8x8xf32>
    %cst_42 = arith.constant dense<0.000000e+00> : vector<8xf32>
    %121 = vector.multi_reduction <add>, %120, %cst_42 [1] : vector<8x8xf32> to vector<8xf32>
    %122 = vector.shape_cast %121 : vector<8xf32> to vector<8x1xf32>
    %123 = vector.broadcast %122 : vector<8x1xf32> to vector<8x8xf32>
    %124 = arith.divf %120, %123 : vector<8x8xf32>
    %cst_43 = arith.constant dense<0.000000e+00> : vector<8x8xf32>
    %125 = tpu.matmul %124, %111, %cst_43 {dimension_numbers = #tpu.dot_dimension_numbers<[1], [0], [0], [1], [0, 0, 1, 1], [], []>} : vector<8x8xf32>, vector<8x8xf32>, vector<8x8xf32> -> vector<8x8xf32>
    %126 = vector.extract_strided_slice %20 {offsets = [8, 16], sizes = [8, 8], strides = [1, 1]} : vector<16x32xf32> to vector<8x8xf32>
    %127 = vector.extract_strided_slice %21 {offsets = [8, 16], sizes = [8, 8], strides = [1, 1]} : vector<16x32xf32> to vector<8x8xf32>
    %128 = vector.extract_strided_slice %22 {offsets = [8, 16], sizes = [8, 8], strides = [1, 1]} : vector<16x32xf32> to vector<8x8xf32>
    %129 = tpu.transpose %127, [1, 0] : vector<8x8xf32> -> vector<8x8xf32>
    %cst_44 = arith.constant dense<0.000000e+00> : vector<8x8xf32>
    %130 = tpu.matmul %126, %129, %cst_44 {dimension_numbers = #tpu.dot_dimension_numbers<[1], [0], [0], [1], [0, 0, 1, 1], [], []>} : vector<8x8xf32>, vector<8x8xf32>, vector<8x8xf32> -> vector<8x8xf32>
    %cst_45 = arith.constant 0.353553385 : f32
    %131 = vector.broadcast %cst_45 : f32 to vector<8x8xf32>
    %132 = arith.mulf %130, %131 : vector<8x8xf32>
    %cst_46 = arith.constant dense<0xFF800000> : vector<8xf32>
    %133 = vector.multi_reduction <maximumf>, %132, %cst_46 [1] : vector<8x8xf32> to vector<8xf32>
    %134 = vector.shape_cast %133 : vector<8xf32> to vector<8x1xf32>
    %135 = vector.broadcast %134 : vector<8x1xf32> to vector<8x8xf32>
    %136 = arith.subf %132, %135 : vector<8x8xf32>
    %137 = math.exp %136 : vector<8x8xf32>
    %cst_47 = arith.constant dense<0.000000e+00> : vector<8xf32>
    %138 = vector.multi_reduction <add>, %137, %cst_47 [1] : vector<8x8xf32> to vector<8xf32>
    %139 = vector.shape_cast %138 : vector<8xf32> to vector<8x1xf32>
    %140 = vector.broadcast %139 : vector<8x1xf32> to vector<8x8xf32>
    %141 = arith.divf %137, %140 : vector<8x8xf32>
    %cst_48 = arith.constant dense<0.000000e+00> : vector<8x8xf32>
    %142 = tpu.matmul %141, %128, %cst_48 {dimension_numbers = #tpu.dot_dimension_numbers<[1], [0], [0], [1], [0, 0, 1, 1], [], []>} : vector<8x8xf32>, vector<8x8xf32>, vector<8x8xf32> -> vector<8x8xf32>
    %143 = vector.extract_strided_slice %20 {offsets = [8, 24], sizes = [8, 8], strides = [1, 1]} : vector<16x32xf32> to vector<8x8xf32>
    %144 = vector.extract_strided_slice %21 {offsets = [8, 24], sizes = [8, 8], strides = [1, 1]} : vector<16x32xf32> to vector<8x8xf32>
    %145 = vector.extract_strided_slice %22 {offsets = [8, 24], sizes = [8, 8], strides = [1, 1]} : vector<16x32xf32> to vector<8x8xf32>
    %146 = tpu.transpose %144, [1, 0] : vector<8x8xf32> -> vector<8x8xf32>
    %cst_49 = arith.constant dense<0.000000e+00> : vector<8x8xf32>
    %147 = tpu.matmul %143, %146, %cst_49 {dimension_numbers = #tpu.dot_dimension_numbers<[1], [0], [0], [1], [0, 0, 1, 1], [], []>} : vector<8x8xf32>, vector<8x8xf32>, vector<8x8xf32> -> vector<8x8xf32>
    %cst_50 = arith.constant 0.353553385 : f32
    %148 = vector.broadcast %cst_50 : f32 to vector<8x8xf32>
    %149 = arith.mulf %147, %148 : vector<8x8xf32>
    %cst_51 = arith.constant dense<0xFF800000> : vector<8xf32>
    %150 = vector.multi_reduction <maximumf>, %149, %cst_51 [1] : vector<8x8xf32> to vector<8xf32>
    %151 = vector.shape_cast %150 : vector<8xf32> to vector<8x1xf32>
    %152 = vector.broadcast %151 : vector<8x1xf32> to vector<8x8xf32>
    %153 = arith.subf %149, %152 : vector<8x8xf32>
    %154 = math.exp %153 : vector<8x8xf32>
    %cst_52 = arith.constant dense<0.000000e+00> : vector<8xf32>
    %155 = vector.multi_reduction <add>, %154, %cst_52 [1] : vector<8x8xf32> to vector<8xf32>
    %156 = vector.shape_cast %155 : vector<8xf32> to vector<8x1xf32>
    %157 = vector.broadcast %156 : vector<8x1xf32> to vector<8x8xf32>
    %158 = arith.divf %154, %157 : vector<8x8xf32>
    %cst_53 = arith.constant dense<0.000000e+00> : vector<8x8xf32>
    %159 = tpu.matmul %158, %145, %cst_53 {dimension_numbers = #tpu.dot_dimension_numbers<[1], [0], [0], [1], [0, 0, 1, 1], [], []>} : vector<8x8xf32>, vector<8x8xf32>, vector<8x8xf32> -> vector<8x8xf32>
    %160 = tpu.concatenate %108, %125, %142, %159 in 1 : vector<8x8xf32>, vector<8x8xf32>, vector<8x8xf32>, vector<8x8xf32> -> vector<8x32xf32>
    %161 = tpu.concatenate %91, %160 in 0 : vector<8x32xf32>, vector<8x32xf32> -> vector<16x32xf32>
    %c0_54 = arith.constant 0 : index
    %c0_55 = arith.constant 0 : index
    %c0_56 = arith.constant 0 : index
    %162 = vector.load %arg6[%c0_54, %c0_55, %c0_56] : memref<2x32x32xf32, #tpu.memory_space<vmem>>, vector<1x32x32xf32>
    %163 = vector.shape_cast %162 : vector<1x32x32xf32> to vector<32x32xf32>
    %cst_57 = arith.constant dense<0.000000e+00> : vector<16x32xf32>
    %164 = tpu.matmul %161, %163, %cst_57 {dimension_numbers = #tpu.dot_dimension_numbers<[1], [0], [0], [1], [0, 0, 1, 1], [], []>} : vector<16x32xf32>, vector<32x32xf32>, vector<16x32xf32> -> vector<16x32xf32>
    %c0_58 = arith.constant 0 : index
    %c0_59 = arith.constant 0 : index
    %c0_60 = arith.constant 0 : index
    %165 = vector.load %arg7[%c0_58, %c0_59, %c0_60] : memref<2x1x32xf32, #tpu.memory_space<vmem>>, vector<1x1x32xf32>
    %166 = vector.shape_cast %165 : vector<1x1x32xf32> to vector<1x32xf32>
    %167 = vector.broadcast %166 : vector<1x32xf32> to vector<16x32xf32>
    %168 = arith.addf %164, %167 : vector<16x32xf32>
    %169 = arith.addf %168, %12 : vector<16x32xf32>
    %c0_61 = arith.constant 0 : index
    %c0_62 = arith.constant 0 : index
    %c0_63 = arith.constant 0 : index
    %170 = vector.load %arg8[%c0_61, %c0_62, %c0_63] : memref<2x1x32xf32, #tpu.memory_space<vmem>>, vector<1x1x32xf32>
    %171 = vector.shape_cast %170 : vector<1x1x32xf32> to vector<1x32xf32>
    %c0_64 = arith.constant 0 : index
    %c0_65 = arith.constant 0 : index
    %c0_66 = arith.constant 0 : index
    %172 = vector.load %arg9[%c0_64, %c0_65, %c0_66] : memref<2x1x32xf32, #tpu.memory_space<vmem>>, vector<1x1x32xf32>
    %173 = vector.shape_cast %172 : vector<1x1x32xf32> to vector<1x32xf32>
    %cst_67 = arith.constant dense<0.000000e+00> : vector<16xf32>
    %174 = vector.multi_reduction <add>, %169, %cst_67 [1] : vector<16x32xf32> to vector<16xf32>
    %175 = vector.shape_cast %174 : vector<16xf32> to vector<16x1xf32>
    %cst_68 = arith.constant 3.200000e+01 : f32
    %176 = vector.broadcast %cst_68 : f32 to vector<16x1xf32>
    %177 = arith.divf %175, %176 : vector<16x1xf32>
    %178 = vector.broadcast %177 : vector<16x1xf32> to vector<16x32xf32>
    %179 = arith.subf %169, %178 : vector<16x32xf32>
    %180 = arith.mulf %179, %179 : vector<16x32xf32>
    %cst_69 = arith.constant dense<0.000000e+00> : vector<16xf32>
    %181 = vector.multi_reduction <add>, %180, %cst_69 [1] : vector<16x32xf32> to vector<16xf32>
    %182 = vector.shape_cast %181 : vector<16xf32> to vector<16x1xf32>
    %cst_70 = arith.constant 3.200000e+01 : f32
    %183 = vector.broadcast %cst_70 : f32 to vector<16x1xf32>
    %184 = arith.divf %182, %183 : vector<16x1xf32>
    %185 = vector.broadcast %177 : vector<16x1xf32> to vector<16x32xf32>
    %186 = arith.subf %169, %185 : vector<16x32xf32>
    %cst_71 = arith.constant 9.99999996E-13 : f32
    %187 = vector.broadcast %cst_71 : f32 to vector<16x1xf32>
    %188 = arith.addf %184, %187 : vector<16x1xf32>
    %189 = math.rsqrt %188 : vector<16x1xf32>
    %190 = vector.broadcast %189 : vector<16x1xf32> to vector<16x32xf32>
    %191 = arith.mulf %186, %190 : vector<16x32xf32>
    %192 = vector.broadcast %171 : vector<1x32xf32> to vector<16x32xf32>
    %193 = arith.mulf %191, %192 : vector<16x32xf32>
    %194 = vector.broadcast %173 : vector<1x32xf32> to vector<16x32xf32>
    %195 = arith.addf %193, %194 : vector<16x32xf32>
    %c0_72 = arith.constant 0 : index
    %c0_73 = arith.constant 0 : index
    %c0_74 = arith.constant 0 : index
    %196 = vector.load %arg10[%c0_72, %c0_73, %c0_74] : memref<2x32x64xf32, #tpu.memory_space<vmem>>, vector<1x32x64xf32>
    %197 = vector.shape_cast %196 : vector<1x32x64xf32> to vector<32x64xf32>
    %cst_75 = arith.constant dense<0.000000e+00> : vector<16x64xf32>
    %198 = tpu.matmul %195, %197, %cst_75 {dimension_numbers = #tpu.dot_dimension_numbers<[1], [0], [0], [1], [0, 0, 1, 1], [], []>} : vector<16x32xf32>, vector<32x64xf32>, vector<16x64xf32> -> vector<16x64xf32>
    %c0_76 = arith.constant 0 : index
    %c0_77 = arith.constant 0 : index
    %c0_78 = arith.constant 0 : index
    %199 = vector.load %arg11[%c0_76, %c0_77, %c0_78] : memref<2x1x64xf32, #tpu.memory_space<vmem>>, vector<1x1x64xf32>
    %200 = vector.shape_cast %199 : vector<1x1x64xf32> to vector<1x64xf32>
    %201 = vector.broadcast %200 : vector<1x64xf32> to vector<16x64xf32>
    %202 = arith.addf %198, %201 : vector<16x64xf32>
    %cst_79 = arith.constant 5.000000e-01 : f32
    %203 = vector.broadcast %cst_79 : f32 to vector<16x64xf32>
    %204 = arith.mulf %203, %202 : vector<16x64xf32>
    %cst_80 = arith.constant 0.707106769 : f32
    %205 = vector.broadcast %cst_80 : f32 to vector<16x64xf32>
    %206 = arith.mulf %202, %205 : vector<16x64xf32>
    %207 = math.erf %206 : vector<16x64xf32>
    %cst_81 = arith.constant 1.000000e+00 : f32
    %208 = vector.broadcast %cst_81 : f32 to vector<16x64xf32>
    %209 = arith.addf %208, %207 : vector<16x64xf32>
    %210 = arith.mulf %204, %209 : vector<16x64xf32>
    %c0_82 = arith.constant 0 : index
    %c0_83 = arith.constant 0 : index
    %c0_84 = arith.constant 0 : index
    %211 = vector.load %arg12[%c0_82, %c0_83, %c0_84] : memref<2x64x32xf32, #tpu.memory_space<vmem>>, vector<1x64x32xf32>
    %212 = vector.shape_cast %211 : vector<1x64x32xf32> to vector<64x32xf32>
    %cst_85 = arith.constant dense<0.000000e+00> : vector<16x32xf32>
    %213 = tpu.matmul %210, %212, %cst_85 {dimension_numbers = #tpu.dot_dimension_numbers<[1], [0], [0], [1], [0, 0, 1, 1], [], []>} : vector<16x64xf32>, vector<64x32xf32>, vector<16x32xf32> -> vector<16x32xf32>
    %c0_86 = arith.constant 0 : index
    %c0_87 = arith.constant 0 : index
    %c0_88 = arith.constant 0 : index
    %214 = vector.load %arg13[%c0_86, %c0_87, %c0_88] : memref<2x1x32xf32, #tpu.memory_space<vmem>>, vector<1x1x32xf32>
    %215 = vector.shape_cast %214 : vector<1x1x32xf32> to vector<1x32xf32>
    %216 = vector.broadcast %215 : vector<1x32xf32> to vector<16x32xf32>
    %217 = arith.addf %213, %216 : vector<16x32xf32>
    %218 = arith.addf %217, %195 : vector<16x32xf32>
    %c0_89 = arith.constant 0 : index
    %c0_90 = arith.constant 0 : index
    %c0_91 = arith.constant 0 : index
    %219 = vector.load %arg14[%c0_89, %c0_90, %c0_91] : memref<2x1x32xf32, #tpu.memory_space<vmem>>, vector<1x1x32xf32>
    %220 = vector.shape_cast %219 : vector<1x1x32xf32> to vector<1x32xf32>
    %c0_92 = arith.constant 0 : index
    %c0_93 = arith.constant 0 : index
    %c0_94 = arith.constant 0 : index
    %221 = vector.load %arg15[%c0_92, %c0_93, %c0_94] : memref<2x1x32xf32, #tpu.memory_space<vmem>>, vector<1x1x32xf32>
    %222 = vector.shape_cast %221 : vector<1x1x32xf32> to vector<1x32xf32>
    %cst_95 = arith.constant dense<0.000000e+00> : vector<16xf32>
    %223 = vector.multi_reduction <add>, %218, %cst_95 [1] : vector<16x32xf32> to vector<16xf32>
    %224 = vector.shape_cast %223 : vector<16xf32> to vector<16x1xf32>
    %cst_96 = arith.constant 3.200000e+01 : f32
    %225 = vector.broadcast %cst_96 : f32 to vector<16x1xf32>
    %226 = arith.divf %224, %225 : vector<16x1xf32>
    %227 = vector.broadcast %226 : vector<16x1xf32> to vector<16x32xf32>
    %228 = arith.subf %218, %227 : vector<16x32xf32>
    %229 = arith.mulf %228, %228 : vector<16x32xf32>
    %cst_97 = arith.constant dense<0.000000e+00> : vector<16xf32>
    %230 = vector.multi_reduction <add>, %229, %cst_97 [1] : vector<16x32xf32> to vector<16xf32>
    %231 = vector.shape_cast %230 : vector<16xf32> to vector<16x1xf32>
    %cst_98 = arith.constant 3.200000e+01 : f32
    %232 = vector.broadcast %cst_98 : f32 to vector<16x1xf32>
    %233 = arith.divf %231, %232 : vector<16x1xf32>
    %234 = vector.broadcast %226 : vector<16x1xf32> to vector<16x32xf32>
    %235 = arith.subf %218, %234 : vector<16x32xf32>
    %cst_99 = arith.constant 9.99999996E-13 : f32
    %236 = vector.broadcast %cst_99 : f32 to vector<16x1xf32>
    %237 = arith.addf %233, %236 : vector<16x1xf32>
    %238 = math.rsqrt %237 : vector<16x1xf32>
    %239 = vector.broadcast %238 : vector<16x1xf32> to vector<16x32xf32>
    %240 = arith.mulf %235, %239 : vector<16x32xf32>
    %241 = vector.broadcast %220 : vector<1x32xf32> to vector<16x32xf32>
    %242 = arith.mulf %240, %241 : vector<16x32xf32>
    %243 = vector.broadcast %222 : vector<1x32xf32> to vector<16x32xf32>
    %244 = arith.addf %242, %243 : vector<16x32xf32>
    %c1 = arith.constant 1 : index
    %c0_100 = arith.constant 0 : index
    %c0_101 = arith.constant 0 : index
    %245 = vector.load %arg4[%c1, %c0_100, %c0_101] : memref<2x32x96xf32, #tpu.memory_space<vmem>>, vector<1x32x96xf32>
    %246 = vector.shape_cast %245 : vector<1x32x96xf32> to vector<32x96xf32>
    %cst_102 = arith.constant dense<0.000000e+00> : vector<16x96xf32>
    %247 = tpu.matmul %244, %246, %cst_102 {dimension_numbers = #tpu.dot_dimension_numbers<[1], [0], [0], [1], [0, 0, 1, 1], [], []>} : vector<16x32xf32>, vector<32x96xf32>, vector<16x96xf32> -> vector<16x96xf32>
    %c1_103 = arith.constant 1 : index
    %c0_104 = arith.constant 0 : index
    %c0_105 = arith.constant 0 : index
    %248 = vector.load %arg5[%c1_103, %c0_104, %c0_105] : memref<2x1x96xf32, #tpu.memory_space<vmem>>, vector<1x1x96xf32>
    %249 = vector.shape_cast %248 : vector<1x1x96xf32> to vector<1x96xf32>
    %250 = vector.broadcast %249 : vector<1x96xf32> to vector<16x96xf32>
    %251 = arith.addf %247, %250 : vector<16x96xf32>
    %252 = vector.extract_strided_slice %251 {offsets = [0, 0], sizes = [16, 32], strides = [1, 1]} : vector<16x96xf32> to vector<16x32xf32>
    %253 = vector.extract_strided_slice %251 {offsets = [0, 32], sizes = [16, 32], strides = [1, 1]} : vector<16x96xf32> to vector<16x32xf32>
    %254 = vector.extract_strided_slice %251 {offsets = [0, 64], sizes = [16, 32], strides = [1, 1]} : vector<16x96xf32> to vector<16x32xf32>
    %255 = vector.extract_strided_slice %252 {offsets = [0, 0], sizes = [8, 8], strides = [1, 1]} : vector<16x32xf32> to vector<8x8xf32>
    %256 = vector.extract_strided_slice %253 {offsets = [0, 0], sizes = [8, 8], strides = [1, 1]} : vector<16x32xf32> to vector<8x8xf32>
    %257 = vector.extract_strided_slice %254 {offsets = [0, 0], sizes = [8, 8], strides = [1, 1]} : vector<16x32xf32> to vector<8x8xf32>
    %258 = tpu.transpose %256, [1, 0] : vector<8x8xf32> -> vector<8x8xf32>
    %cst_106 = arith.constant dense<0.000000e+00> : vector<8x8xf32>
    %259 = tpu.matmul %255, %258, %cst_106 {dimension_numbers = #tpu.dot_dimension_numbers<[1], [0], [0], [1], [0, 0, 1, 1], [], []>} : vector<8x8xf32>, vector<8x8xf32>, vector<8x8xf32> -> vector<8x8xf32>
    %cst_107 = arith.constant 0.353553385 : f32
    %260 = vector.broadcast %cst_107 : f32 to vector<8x8xf32>
    %261 = arith.mulf %259, %260 : vector<8x8xf32>
    %cst_108 = arith.constant dense<0xFF800000> : vector<8xf32>
    %262 = vector.multi_reduction <maximumf>, %261, %cst_108 [1] : vector<8x8xf32> to vector<8xf32>
    %263 = vector.shape_cast %262 : vector<8xf32> to vector<8x1xf32>
    %264 = vector.broadcast %263 : vector<8x1xf32> to vector<8x8xf32>
    %265 = arith.subf %261, %264 : vector<8x8xf32>
    %266 = math.exp %265 : vector<8x8xf32>
    %cst_109 = arith.constant dense<0.000000e+00> : vector<8xf32>
    %267 = vector.multi_reduction <add>, %266, %cst_109 [1] : vector<8x8xf32> to vector<8xf32>
    %268 = vector.shape_cast %267 : vector<8xf32> to vector<8x1xf32>
    %269 = vector.broadcast %268 : vector<8x1xf32> to vector<8x8xf32>
    %270 = arith.divf %266, %269 : vector<8x8xf32>
    %cst_110 = arith.constant dense<0.000000e+00> : vector<8x8xf32>
    %271 = tpu.matmul %270, %257, %cst_110 {dimension_numbers = #tpu.dot_dimension_numbers<[1], [0], [0], [1], [0, 0, 1, 1], [], []>} : vector<8x8xf32>, vector<8x8xf32>, vector<8x8xf32> -> vector<8x8xf32>
    %272 = vector.extract_strided_slice %252 {offsets = [0, 8], sizes = [8, 8], strides = [1, 1]} : vector<16x32xf32> to vector<8x8xf32>
    %273 = vector.extract_strided_slice %253 {offsets = [0, 8], sizes = [8, 8], strides = [1, 1]} : vector<16x32xf32> to vector<8x8xf32>
    %274 = vector.extract_strided_slice %254 {offsets = [0, 8], sizes = [8, 8], strides = [1, 1]} : vector<16x32xf32> to vector<8x8xf32>
    %275 = tpu.transpose %273, [1, 0] : vector<8x8xf32> -> vector<8x8xf32>
    %cst_111 = arith.constant dense<0.000000e+00> : vector<8x8xf32>
    %276 = tpu.matmul %272, %275, %cst_111 {dimension_numbers = #tpu.dot_dimension_numbers<[1], [0], [0], [1], [0, 0, 1, 1], [], []>} : vector<8x8xf32>, vector<8x8xf32>, vector<8x8xf32> -> vector<8x8xf32>
    %cst_112 = arith.constant 0.353553385 : f32
    %277 = vector.broadcast %cst_112 : f32 to vector<8x8xf32>
    %278 = arith.mulf %276, %277 : vector<8x8xf32>
    %cst_113 = arith.constant dense<0xFF800000> : vector<8xf32>
    %279 = vector.multi_reduction <maximumf>, %278, %cst_113 [1] : vector<8x8xf32> to vector<8xf32>
    %280 = vector.shape_cast %279 : vector<8xf32> to vector<8x1xf32>
    %281 = vector.broadcast %280 : vector<8x1xf32> to vector<8x8xf32>
    %282 = arith.subf %278, %281 : vector<8x8xf32>
    %283 = math.exp %282 : vector<8x8xf32>
    %cst_114 = arith.constant dense<0.000000e+00> : vector<8xf32>
    %284 = vector.multi_reduction <add>, %283, %cst_114 [1] : vector<8x8xf32> to vector<8xf32>
    %285 = vector.shape_cast %284 : vector<8xf32> to vector<8x1xf32>
    %286 = vector.broadcast %285 : vector<8x1xf32> to vector<8x8xf32>
    %287 = arith.divf %283, %286 : vector<8x8xf32>
    %cst_115 = arith.constant dense<0.000000e+00> : vector<8x8xf32>
    %288 = tpu.matmul %287, %274, %cst_115 {dimension_numbers = #tpu.dot_dimension_numbers<[1], [0], [0], [1], [0, 0, 1, 1], [], []>} : vector<8x8xf32>, vector<8x8xf32>, vector<8x8xf32> -> vector<8x8xf32>
    %289 = vector.extract_strided_slice %252 {offsets = [0, 16], sizes = [8, 8], strides = [1, 1]} : vector<16x32xf32> to vector<8x8xf32>
    %290 = vector.extract_strided_slice %253 {offsets = [0, 16], sizes = [8, 8], strides = [1, 1]} : vector<16x32xf32> to vector<8x8xf32>
    %291 = vector.extract_strided_slice %254 {offsets = [0, 16], sizes = [8, 8], strides = [1, 1]} : vector<16x32xf32> to vector<8x8xf32>
    %292 = tpu.transpose %290, [1, 0] : vector<8x8xf32> -> vector<8x8xf32>
    %cst_116 = arith.constant dense<0.000000e+00> : vector<8x8xf32>
    %293 = tpu.matmul %289, %292, %cst_116 {dimension_numbers = #tpu.dot_dimension_numbers<[1], [0], [0], [1], [0, 0, 1, 1], [], []>} : vector<8x8xf32>, vector<8x8xf32>, vector<8x8xf32> -> vector<8x8xf32>
    %cst_117 = arith.constant 0.353553385 : f32
    %294 = vector.broadcast %cst_117 : f32 to vector<8x8xf32>
    %295 = arith.mulf %293, %294 : vector<8x8xf32>
    %cst_118 = arith.constant dense<0xFF800000> : vector<8xf32>
    %296 = vector.multi_reduction <maximumf>, %295, %cst_118 [1] : vector<8x8xf32> to vector<8xf32>
    %297 = vector.shape_cast %296 : vector<8xf32> to vector<8x1xf32>
    %298 = vector.broadcast %297 : vector<8x1xf32> to vector<8x8xf32>
    %299 = arith.subf %295, %298 : vector<8x8xf32>
    %300 = math.exp %299 : vector<8x8xf32>
    %cst_119 = arith.constant dense<0.000000e+00> : vector<8xf32>
    %301 = vector.multi_reduction <add>, %300, %cst_119 [1] : vector<8x8xf32> to vector<8xf32>
    %302 = vector.shape_cast %301 : vector<8xf32> to vector<8x1xf32>
    %303 = vector.broadcast %302 : vector<8x1xf32> to vector<8x8xf32>
    %304 = arith.divf %300, %303 : vector<8x8xf32>
    %cst_120 = arith.constant dense<0.000000e+00> : vector<8x8xf32>
    %305 = tpu.matmul %304, %291, %cst_120 {dimension_numbers = #tpu.dot_dimension_numbers<[1], [0], [0], [1], [0, 0, 1, 1], [], []>} : vector<8x8xf32>, vector<8x8xf32>, vector<8x8xf32> -> vector<8x8xf32>
    %306 = vector.extract_strided_slice %252 {offsets = [0, 24], sizes = [8, 8], strides = [1, 1]} : vector<16x32xf32> to vector<8x8xf32>
    %307 = vector.extract_strided_slice %253 {offsets = [0, 24], sizes = [8, 8], strides = [1, 1]} : vector<16x32xf32> to vector<8x8xf32>
    %308 = vector.extract_strided_slice %254 {offsets = [0, 24], sizes = [8, 8], strides = [1, 1]} : vector<16x32xf32> to vector<8x8xf32>
    %309 = tpu.transpose %307, [1, 0] : vector<8x8xf32> -> vector<8x8xf32>
    %cst_121 = arith.constant dense<0.000000e+00> : vector<8x8xf32>
    %310 = tpu.matmul %306, %309, %cst_121 {dimension_numbers = #tpu.dot_dimension_numbers<[1], [0], [0], [1], [0, 0, 1, 1], [], []>} : vector<8x8xf32>, vector<8x8xf32>, vector<8x8xf32> -> vector<8x8xf32>
    %cst_122 = arith.constant 0.353553385 : f32
    %311 = vector.broadcast %cst_122 : f32 to vector<8x8xf32>
    %312 = arith.mulf %310, %311 : vector<8x8xf32>
    %cst_123 = arith.constant dense<0xFF800000> : vector<8xf32>
    %313 = vector.multi_reduction <maximumf>, %312, %cst_123 [1] : vector<8x8xf32> to vector<8xf32>
    %314 = vector.shape_cast %313 : vector<8xf32> to vector<8x1xf32>
    %315 = vector.broadcast %314 : vector<8x1xf32> to vector<8x8xf32>
    %316 = arith.subf %312, %315 : vector<8x8xf32>
    %317 = math.exp %316 : vector<8x8xf32>
    %cst_124 = arith.constant dense<0.000000e+00> : vector<8xf32>
    %318 = vector.multi_reduction <add>, %317, %cst_124 [1] : vector<8x8xf32> to vector<8xf32>
    %319 = vector.shape_cast %318 : vector<8xf32> to vector<8x1xf32>
    %320 = vector.broadcast %319 : vector<8x1xf32> to vector<8x8xf32>
    %321 = arith.divf %317, %320 : vector<8x8xf32>
    %cst_125 = arith.constant dense<0.000000e+00> : vector<8x8xf32>
    %322 = tpu.matmul %321, %308, %cst_125 {dimension_numbers = #tpu.dot_dimension_numbers<[1], [0], [0], [1], [0, 0, 1, 1], [], []>} : vector<8x8xf32>, vector<8x8xf32>, vector<8x8xf32> -> vector<8x8xf32>
    %323 = tpu.concatenate %271, %288, %305, %322 in 1 : vector<8x8xf32>, vector<8x8xf32>, vector<8x8xf32>, vector<8x8xf32> -> vector<8x32xf32>
    %324 = vector.extract_strided_slice %252 {offsets = [8, 0], sizes = [8, 8], strides = [1, 1]} : vector<16x32xf32> to vector<8x8xf32>
    %325 = vector.extract_strided_slice %253 {offsets = [8, 0], sizes = [8, 8], strides = [1, 1]} : vector<16x32xf32> to vector<8x8xf32>
    %326 = vector.extract_strided_slice %254 {offsets = [8, 0], sizes = [8, 8], strides = [1, 1]} : vector<16x32xf32> to vector<8x8xf32>
    %327 = tpu.transpose %325, [1, 0] : vector<8x8xf32> -> vector<8x8xf32>
    %cst_126 = arith.constant dense<0.000000e+00> : vector<8x8xf32>
    %328 = tpu.matmul %324, %327, %cst_126 {dimension_numbers = #tpu.dot_dimension_numbers<[1], [0], [0], [1], [0, 0, 1, 1], [], []>} : vector<8x8xf32>, vector<8x8xf32>, vector<8x8xf32> -> vector<8x8xf32>
    %cst_127 = arith.constant 0.353553385 : f32
    %329 = vector.broadcast %cst_127 : f32 to vector<8x8xf32>
    %330 = arith.mulf %328, %329 : vector<8x8xf32>
    %cst_128 = arith.constant dense<0xFF800000> : vector<8xf32>
    %331 = vector.multi_reduction <maximumf>, %330, %cst_128 [1] : vector<8x8xf32> to vector<8xf32>
    %332 = vector.shape_cast %331 : vector<8xf32> to vector<8x1xf32>
    %333 = vector.broadcast %332 : vector<8x1xf32> to vector<8x8xf32>
    %334 = arith.subf %330, %333 : vector<8x8xf32>
    %335 = math.exp %334 : vector<8x8xf32>
    %cst_129 = arith.constant dense<0.000000e+00> : vector<8xf32>
    %336 = vector.multi_reduction <add>, %335, %cst_129 [1] : vector<8x8xf32> to vector<8xf32>
    %337 = vector.shape_cast %336 : vector<8xf32> to vector<8x1xf32>
    %338 = vector.broadcast %337 : vector<8x1xf32> to vector<8x8xf32>
    %339 = arith.divf %335, %338 : vector<8x8xf32>
    %cst_130 = arith.constant dense<0.000000e+00> : vector<8x8xf32>
    %340 = tpu.matmul %339, %326, %cst_130 {dimension_numbers = #tpu.dot_dimension_numbers<[1], [0], [0], [1], [0, 0, 1, 1], [], []>} : vector<8x8xf32>, vector<8x8xf32>, vector<8x8xf32> -> vector<8x8xf32>
    %341 = vector.extract_strided_slice %252 {offsets = [8, 8], sizes = [8, 8], strides = [1, 1]} : vector<16x32xf32> to vector<8x8xf32>
    %342 = vector.extract_strided_slice %253 {offsets = [8, 8], sizes = [8, 8], strides = [1, 1]} : vector<16x32xf32> to vector<8x8xf32>
    %343 = vector.extract_strided_slice %254 {offsets = [8, 8], sizes = [8, 8], strides = [1, 1]} : vector<16x32xf32> to vector<8x8xf32>
    %344 = tpu.transpose %342, [1, 0] : vector<8x8xf32> -> vector<8x8xf32>
    %cst_131 = arith.constant dense<0.000000e+00> : vector<8x8xf32>
    %345 = tpu.matmul %341, %344, %cst_131 {dimension_numbers = #tpu.dot_dimension_numbers<[1], [0], [0], [1], [0, 0, 1, 1], [], []>} : vector<8x8xf32>, vector<8x8xf32>, vector<8x8xf32> -> vector<8x8xf32>
    %cst_132 = arith.constant 0.353553385 : f32
    %346 = vector.broadcast %cst_132 : f32 to vector<8x8xf32>
    %347 = arith.mulf %345, %346 : vector<8x8xf32>
    %cst_133 = arith.constant dense<0xFF800000> : vector<8xf32>
    %348 = vector.multi_reduction <maximumf>, %347, %cst_133 [1] : vector<8x8xf32> to vector<8xf32>
    %349 = vector.shape_cast %348 : vector<8xf32> to vector<8x1xf32>
    %350 = vector.broadcast %349 : vector<8x1xf32> to vector<8x8xf32>
    %351 = arith.subf %347, %350 : vector<8x8xf32>
    %352 = math.exp %351 : vector<8x8xf32>
    %cst_134 = arith.constant dense<0.000000e+00> : vector<8xf32>
    %353 = vector.multi_reduction <add>, %352, %cst_134 [1] : vector<8x8xf32> to vector<8xf32>
    %354 = vector.shape_cast %353 : vector<8xf32> to vector<8x1xf32>
    %355 = vector.broadcast %354 : vector<8x1xf32> to vector<8x8xf32>
    %356 = arith.divf %352, %355 : vector<8x8xf32>
    %cst_135 = arith.constant dense<0.000000e+00> : vector<8x8xf32>
    %357 = tpu.matmul %356, %343, %cst_135 {dimension_numbers = #tpu.dot_dimension_numbers<[1], [0], [0], [1], [0, 0, 1, 1], [], []>} : vector<8x8xf32>, vector<8x8xf32>, vector<8x8xf32> -> vector<8x8xf32>
    %358 = vector.extract_strided_slice %252 {offsets = [8, 16], sizes = [8, 8], strides = [1, 1]} : vector<16x32xf32> to vector<8x8xf32>
    %359 = vector.extract_strided_slice %253 {offsets = [8, 16], sizes = [8, 8], strides = [1, 1]} : vector<16x32xf32> to vector<8x8xf32>
    %360 = vector.extract_strided_slice %254 {offsets = [8, 16], sizes = [8, 8], strides = [1, 1]} : vector<16x32xf32> to vector<8x8xf32>
    %361 = tpu.transpose %359, [1, 0] : vector<8x8xf32> -> vector<8x8xf32>
    %cst_136 = arith.constant dense<0.000000e+00> : vector<8x8xf32>
    %362 = tpu.matmul %358, %361, %cst_136 {dimension_numbers = #tpu.dot_dimension_numbers<[1], [0], [0], [1], [0, 0, 1, 1], [], []>} : vector<8x8xf32>, vector<8x8xf32>, vector<8x8xf32> -> vector<8x8xf32>
    %cst_137 = arith.constant 0.353553385 : f32
    %363 = vector.broadcast %cst_137 : f32 to vector<8x8xf32>
    %364 = arith.mulf %362, %363 : vector<8x8xf32>
    %cst_138 = arith.constant dense<0xFF800000> : vector<8xf32>
    %365 = vector.multi_reduction <maximumf>, %364, %cst_138 [1] : vector<8x8xf32> to vector<8xf32>
    %366 = vector.shape_cast %365 : vector<8xf32> to vector<8x1xf32>
    %367 = vector.broadcast %366 : vector<8x1xf32> to vector<8x8xf32>
    %368 = arith.subf %364, %367 : vector<8x8xf32>
    %369 = math.exp %368 : vector<8x8xf32>
    %cst_139 = arith.constant dense<0.000000e+00> : vector<8xf32>
    %370 = vector.multi_reduction <add>, %369, %cst_139 [1] : vector<8x8xf32> to vector<8xf32>
    %371 = vector.shape_cast %370 : vector<8xf32> to vector<8x1xf32>
    %372 = vector.broadcast %371 : vector<8x1xf32> to vector<8x8xf32>
    %373 = arith.divf %369, %372 : vector<8x8xf32>
    %cst_140 = arith.constant dense<0.000000e+00> : vector<8x8xf32>
    %374 = tpu.matmul %373, %360, %cst_140 {dimension_numbers = #tpu.dot_dimension_numbers<[1], [0], [0], [1], [0, 0, 1, 1], [], []>} : vector<8x8xf32>, vector<8x8xf32>, vector<8x8xf32> -> vector<8x8xf32>
    %375 = vector.extract_strided_slice %252 {offsets = [8, 24], sizes = [8, 8], strides = [1, 1]} : vector<16x32xf32> to vector<8x8xf32>
    %376 = vector.extract_strided_slice %253 {offsets = [8, 24], sizes = [8, 8], strides = [1, 1]} : vector<16x32xf32> to vector<8x8xf32>
    %377 = vector.extract_strided_slice %254 {offsets = [8, 24], sizes = [8, 8], strides = [1, 1]} : vector<16x32xf32> to vector<8x8xf32>
    %378 = tpu.transpose %376, [1, 0] : vector<8x8xf32> -> vector<8x8xf32>
    %cst_141 = arith.constant dense<0.000000e+00> : vector<8x8xf32>
    %379 = tpu.matmul %375, %378, %cst_141 {dimension_numbers = #tpu.dot_dimension_numbers<[1], [0], [0], [1], [0, 0, 1, 1], [], []>} : vector<8x8xf32>, vector<8x8xf32>, vector<8x8xf32> -> vector<8x8xf32>
    %cst_142 = arith.constant 0.353553385 : f32
    %380 = vector.broadcast %cst_142 : f32 to vector<8x8xf32>
    %381 = arith.mulf %379, %380 : vector<8x8xf32>
    %cst_143 = arith.constant dense<0xFF800000> : vector<8xf32>
    %382 = vector.multi_reduction <maximumf>, %381, %cst_143 [1] : vector<8x8xf32> to vector<8xf32>
    %383 = vector.shape_cast %382 : vector<8xf32> to vector<8x1xf32>
    %384 = vector.broadcast %383 : vector<8x1xf32> to vector<8x8xf32>
    %385 = arith.subf %381, %384 : vector<8x8xf32>
    %386 = math.exp %385 : vector<8x8xf32>
    %cst_144 = arith.constant dense<0.000000e+00> : vector<8xf32>
    %387 = vector.multi_reduction <add>, %386, %cst_144 [1] : vector<8x8xf32> to vector<8xf32>
    %388 = vector.shape_cast %387 : vector<8xf32> to vector<8x1xf32>
    %389 = vector.broadcast %388 : vector<8x1xf32> to vector<8x8xf32>
    %390 = arith.divf %386, %389 : vector<8x8xf32>
    %cst_145 = arith.constant dense<0.000000e+00> : vector<8x8xf32>
    %391 = tpu.matmul %390, %377, %cst_145 {dimension_numbers = #tpu.dot_dimension_numbers<[1], [0], [0], [1], [0, 0, 1, 1], [], []>} : vector<8x8xf32>, vector<8x8xf32>, vector<8x8xf32> -> vector<8x8xf32>
    %392 = tpu.concatenate %340, %357, %374, %391 in 1 : vector<8x8xf32>, vector<8x8xf32>, vector<8x8xf32>, vector<8x8xf32> -> vector<8x32xf32>
    %393 = tpu.concatenate %323, %392 in 0 : vector<8x32xf32>, vector<8x32xf32> -> vector<16x32xf32>
    %c1_146 = arith.constant 1 : index
    %c0_147 = arith.constant 0 : index
    %c0_148 = arith.constant 0 : index
    %394 = vector.load %arg6[%c1_146, %c0_147, %c0_148] : memref<2x32x32xf32, #tpu.memory_space<vmem>>, vector<1x32x32xf32>
    %395 = vector.shape_cast %394 : vector<1x32x32xf32> to vector<32x32xf32>
    %cst_149 = arith.constant dense<0.000000e+00> : vector<16x32xf32>
    %396 = tpu.matmul %393, %395, %cst_149 {dimension_numbers = #tpu.dot_dimension_numbers<[1], [0], [0], [1], [0, 0, 1, 1], [], []>} : vector<16x32xf32>, vector<32x32xf32>, vector<16x32xf32> -> vector<16x32xf32>
    %c1_150 = arith.constant 1 : index
    %c0_151 = arith.constant 0 : index
    %c0_152 = arith.constant 0 : index
    %397 = vector.load %arg7[%c1_150, %c0_151, %c0_152] : memref<2x1x32xf32, #tpu.memory_space<vmem>>, vector<1x1x32xf32>
    %398 = vector.shape_cast %397 : vector<1x1x32xf32> to vector<1x32xf32>
    %399 = vector.broadcast %398 : vector<1x32xf32> to vector<16x32xf32>
    %400 = arith.addf %396, %399 : vector<16x32xf32>
    %401 = arith.addf %400, %244 : vector<16x32xf32>
    %c1_153 = arith.constant 1 : index
    %c0_154 = arith.constant 0 : index
    %c0_155 = arith.constant 0 : index
    %402 = vector.load %arg8[%c1_153, %c0_154, %c0_155] : memref<2x1x32xf32, #tpu.memory_space<vmem>>, vector<1x1x32xf32>
    %403 = vector.shape_cast %402 : vector<1x1x32xf32> to vector<1x32xf32>
    %c1_156 = arith.constant 1 : index
    %c0_157 = arith.constant 0 : index
    %c0_158 = arith.constant 0 : index
    %404 = vector.load %arg9[%c1_156, %c0_157, %c0_158] : memref<2x1x32xf32, #tpu.memory_space<vmem>>, vector<1x1x32xf32>
    %405 = vector.shape_cast %404 : vector<1x1x32xf32> to vector<1x32xf32>
    %cst_159 = arith.constant dense<0.000000e+00> : vector<16xf32>
    %406 = vector.multi_reduction <add>, %401, %cst_159 [1] : vector<16x32xf32> to vector<16xf32>
    %407 = vector.shape_cast %406 : vector<16xf32> to vector<16x1xf32>
    %cst_160 = arith.constant 3.200000e+01 : f32
    %408 = vector.broadcast %cst_160 : f32 to vector<16x1xf32>
    %409 = arith.divf %407, %408 : vector<16x1xf32>
    %410 = vector.broadcast %409 : vector<16x1xf32> to vector<16x32xf32>
    %411 = arith.subf %401, %410 : vector<16x32xf32>
    %412 = arith.mulf %411, %411 : vector<16x32xf32>
    %cst_161 = arith.constant dense<0.000000e+00> : vector<16xf32>
    %413 = vector.multi_reduction <add>, %412, %cst_161 [1] : vector<16x32xf32> to vector<16xf32>
    %414 = vector.shape_cast %413 : vector<16xf32> to vector<16x1xf32>
    %cst_162 = arith.constant 3.200000e+01 : f32
    %415 = vector.broadcast %cst_162 : f32 to vector<16x1xf32>
    %416 = arith.divf %414, %415 : vector<16x1xf32>
    %417 = vector.broadcast %409 : vector<16x1xf32> to vector<16x32xf32>
    %418 = arith.subf %401, %417 : vector<16x32xf32>
    %cst_163 = arith.constant 9.99999996E-13 : f32
    %419 = vector.broadcast %cst_163 : f32 to vector<16x1xf32>
    %420 = arith.addf %416, %419 : vector<16x1xf32>
    %421 = math.rsqrt %420 : vector<16x1xf32>
    %422 = vector.broadcast %421 : vector<16x1xf32> to vector<16x32xf32>
    %423 = arith.mulf %418, %422 : vector<16x32xf32>
    %424 = vector.broadcast %403 : vector<1x32xf32> to vector<16x32xf32>
    %425 = arith.mulf %423, %424 : vector<16x32xf32>
    %426 = vector.broadcast %405 : vector<1x32xf32> to vector<16x32xf32>
    %427 = arith.addf %425, %426 : vector<16x32xf32>
    %c1_164 = arith.constant 1 : index
    %c0_165 = arith.constant 0 : index
    %c0_166 = arith.constant 0 : index
    %428 = vector.load %arg10[%c1_164, %c0_165, %c0_166] : memref<2x32x64xf32, #tpu.memory_space<vmem>>, vector<1x32x64xf32>
    %429 = vector.shape_cast %428 : vector<1x32x64xf32> to vector<32x64xf32>
    %cst_167 = arith.constant dense<0.000000e+00> : vector<16x64xf32>
    %430 = tpu.matmul %427, %429, %cst_167 {dimension_numbers = #tpu.dot_dimension_numbers<[1], [0], [0], [1], [0, 0, 1, 1], [], []>} : vector<16x32xf32>, vector<32x64xf32>, vector<16x64xf32> -> vector<16x64xf32>
    %c1_168 = arith.constant 1 : index
    %c0_169 = arith.constant 0 : index
    %c0_170 = arith.constant 0 : index
    %431 = vector.load %arg11[%c1_168, %c0_169, %c0_170] : memref<2x1x64xf32, #tpu.memory_space<vmem>>, vector<1x1x64xf32>
    %432 = vector.shape_cast %431 : vector<1x1x64xf32> to vector<1x64xf32>
    %433 = vector.broadcast %432 : vector<1x64xf32> to vector<16x64xf32>
    %434 = arith.addf %430, %433 : vector<16x64xf32>
    %cst_171 = arith.constant 5.000000e-01 : f32
    %435 = vector.broadcast %cst_171 : f32 to vector<16x64xf32>
    %436 = arith.mulf %435, %434 : vector<16x64xf32>
    %cst_172 = arith.constant 0.707106769 : f32
    %437 = vector.broadcast %cst_172 : f32 to vector<16x64xf32>
    %438 = arith.mulf %434, %437 : vector<16x64xf32>
    %439 = math.erf %438 : vector<16x64xf32>
    %cst_173 = arith.constant 1.000000e+00 : f32
    %440 = vector.broadcast %cst_173 : f32 to vector<16x64xf32>
    %441 = arith.addf %440, %439 : vector<16x64xf32>
    %442 = arith.mulf %436, %441 : vector<16x64xf32>
    %c1_174 = arith.constant 1 : index
    %c0_175 = arith.constant 0 : index
    %c0_176 = arith.constant 0 : index
    %443 = vector.load %arg12[%c1_174, %c0_175, %c0_176] : memref<2x64x32xf32, #tpu.memory_space<vmem>>, vector<1x64x32xf32>
    %444 = vector.shape_cast %443 : vector<1x64x32xf32> to vector<64x32xf32>
    %cst_177 = arith.constant dense<0.000000e+00> : vector<16x32xf32>
    %445 = tpu.matmul %442, %444, %cst_177 {dimension_numbers = #tpu.dot_dimension_numbers<[1], [0], [0], [1], [0, 0, 1, 1], [], []>} : vector<16x64xf32>, vector<64x32xf32>, vector<16x32xf32> -> vector<16x32xf32>
    %c1_178 = arith.constant 1 : index
    %c0_179 = arith.constant 0 : index
    %c0_180 = arith.constant 0 : index
    %446 = vector.load %arg13[%c1_178, %c0_179, %c0_180] : memref<2x1x32xf32, #tpu.memory_space<vmem>>, vector<1x1x32xf32>
    %447 = vector.shape_cast %446 : vector<1x1x32xf32> to vector<1x32xf32>
    %448 = vector.broadcast %447 : vector<1x32xf32> to vector<16x32xf32>
    %449 = arith.addf %445, %448 : vector<16x32xf32>
    %450 = arith.addf %449, %427 : vector<16x32xf32>
    %c1_181 = arith.constant 1 : index
    %c0_182 = arith.constant 0 : index
    %c0_183 = arith.constant 0 : index
    %451 = vector.load %arg14[%c1_181, %c0_182, %c0_183] : memref<2x1x32xf32, #tpu.memory_space<vmem>>, vector<1x1x32xf32>
    %452 = vector.shape_cast %451 : vector<1x1x32xf32> to vector<1x32xf32>
    %c1_184 = arith.constant 1 : index
    %c0_185 = arith.constant 0 : index
    %c0_186 = arith.constant 0 : index
    %453 = vector.load %arg15[%c1_184, %c0_185, %c0_186] : memref<2x1x32xf32, #tpu.memory_space<vmem>>, vector<1x1x32xf32>
    %454 = vector.shape_cast %453 : vector<1x1x32xf32> to vector<1x32xf32>
    %cst_187 = arith.constant dense<0.000000e+00> : vector<16xf32>
    %455 = vector.multi_reduction <add>, %450, %cst_187 [1] : vector<16x32xf32> to vector<16xf32>
    %456 = vector.shape_cast %455 : vector<16xf32> to vector<16x1xf32>
    %cst_188 = arith.constant 3.200000e+01 : f32
    %457 = vector.broadcast %cst_188 : f32 to vector<16x1xf32>
    %458 = arith.divf %456, %457 : vector<16x1xf32>
    %459 = vector.broadcast %458 : vector<16x1xf32> to vector<16x32xf32>
    %460 = arith.subf %450, %459 : vector<16x32xf32>
    %461 = arith.mulf %460, %460 : vector<16x32xf32>
    %cst_189 = arith.constant dense<0.000000e+00> : vector<16xf32>
    %462 = vector.multi_reduction <add>, %461, %cst_189 [1] : vector<16x32xf32> to vector<16xf32>
    %463 = vector.shape_cast %462 : vector<16xf32> to vector<16x1xf32>
    %cst_190 = arith.constant 3.200000e+01 : f32
    %464 = vector.broadcast %cst_190 : f32 to vector<16x1xf32>
    %465 = arith.divf %463, %464 : vector<16x1xf32>
    %466 = vector.broadcast %458 : vector<16x1xf32> to vector<16x32xf32>
    %467 = arith.subf %450, %466 : vector<16x32xf32>
    %cst_191 = arith.constant 9.99999996E-13 : f32
    %468 = vector.broadcast %cst_191 : f32 to vector<16x1xf32>
    %469 = arith.addf %465, %468 : vector<16x1xf32>
    %470 = math.rsqrt %469 : vector<16x1xf32>
    %471 = vector.broadcast %470 : vector<16x1xf32> to vector<16x32xf32>
    %472 = arith.mulf %467, %471 : vector<16x32xf32>
    %473 = vector.broadcast %452 : vector<1x32xf32> to vector<16x32xf32>
    %474 = arith.mulf %472, %473 : vector<16x32xf32>
    %475 = vector.broadcast %454 : vector<1x32xf32> to vector<16x32xf32>
    %476 = arith.addf %474, %475 : vector<16x32xf32>
    %477 = vector.extract_strided_slice %476 {offsets = [0, 0], sizes = [8, 32], strides = [1, 1]} : vector<16x32xf32> to vector<8x32xf32>
    %cst_192 = arith.constant dense<0.000000e+00> : vector<32xf32>
    %478 = vector.multi_reduction <add>, %477, %cst_192 [0] : vector<8x32xf32> to vector<32xf32>
    %479 = vector.shape_cast %478 : vector<32xf32> to vector<1x32xf32>
    %cst_193 = arith.constant 8.000000e+00 : f32
    %480 = vector.broadcast %cst_193 : f32 to vector<1x32xf32>
    %481 = arith.divf %479, %480 : vector<1x32xf32>
    %482 = vector.extract_strided_slice %476 {offsets = [8, 0], sizes = [8, 32], strides = [1, 1]} : vector<16x32xf32> to vector<8x32xf32>
    %cst_194 = arith.constant dense<0.000000e+00> : vector<32xf32>
    %483 = vector.multi_reduction <add>, %482, %cst_194 [0] : vector<8x32xf32> to vector<32xf32>
    %484 = vector.shape_cast %483 : vector<32xf32> to vector<1x32xf32>
    %cst_195 = arith.constant 8.000000e+00 : f32
    %485 = vector.broadcast %cst_195 : f32 to vector<1x32xf32>
    %486 = arith.divf %484, %485 : vector<1x32xf32>
    %487 = tpu.concatenate %481, %486 in 0 : vector<1x32xf32>, vector<1x32xf32> -> vector<2x32xf32>
    %c0_196 = arith.constant 0 : index
    %c0_197 = arith.constant 0 : index
    %488 = vector.load %arg16[%c0_196, %c0_197] : memref<32x1xf32, #tpu.memory_space<vmem>>, vector<32x1xf32>
    %cst_198 = arith.constant dense<0.000000e+00> : vector<2x1xf32>
    %489 = tpu.matmul %487, %488, %cst_198 {dimension_numbers = #tpu.dot_dimension_numbers<[1], [0], [0], [1], [0, 0, 1, 1], [], []>} : vector<2x32xf32>, vector<32x1xf32>, vector<2x1xf32> -> vector<2x1xf32>
    %c0_199 = arith.constant 0 : index
    %c0_200 = arith.constant 0 : index
    %490 = vector.load %arg17[%c0_199, %c0_200] : memref<1x1xf32, #tpu.memory_space<vmem>>, vector<1x1xf32>
    %491 = vector.broadcast %490 : vector<1x1xf32> to vector<2x1xf32>
    %492 = arith.addf %489, %491 : vector<2x1xf32>
    %c0_201 = arith.constant 0 : index
    %c0_202 = arith.constant 0 : index
    %493 = vector.load %arg18[%c0_201, %c0_202] : memref<2x1xf32, #tpu.memory_space<vmem>>, vector<2x1xf32>
    tpu.vector_store %arg18[%c0_201, %c0_202], %492 {strides = array<i32>} : memref<2x1xf32, #tpu.memory_space<vmem>>, vector<2x1xf32>,
    return
  }
}

</mosaic_0001>

<bundles_post_ra>
// kernel: tpu_custom_call.1
= control target key start
LH: loop header
LB: loop body
LE: loop exit
PB: predicated region body
PF: predicated region fallthrough
CT: control target
= control target key end

     0   :  { %v4588_v0 = vmov 0   ;;  %vm107_vm0 = vcmask 261120   ;;  %v4589_v22 = vmov 0.0   ;;  %vm4590_vm1 = vmmov 0   ;;  %s4592_s21 = smov 88   ;;  %s4593_s22 = smov 120   ;;  %s5305_s0 = inlined_call_operand.vmem [shape: f32[16,1], index: 0, kind: input, shape index: {}]   ;;  %s5306_s4 = inlined_call_operand.vmem [shape: f32[2,32,96], index: 4, kind: input, shape index: {}]   ;;  %s5307_s2 = inlined_call_operand.vmem [shape: f32[1,32], index: 2, kind: input, shape index: {}]   ;;  %s5308_s3 = inlined_call_operand.vmem [shape: f32[1,32], index: 3, kind: input, shape index: {}]   ;;  %s5309_s1 = inlined_call_operand.vmem [shape: f32[8,32], index: 1, kind: input, shape index: {}]   ;;  %s5310_s5 = inlined_call_operand.vmem [shape: f32[2,1,96], index: 5, kind: input, shape index: {}]   ;;  %s5311_s6 = inlined_call_operand.vmem [shape: f32[2,32,32], index: 6, kind: input, shape index: {}]   ;;  %s5312_s7 = inlined_call_operand.vmem [shape: f32[2,1,32], index: 7, kind: input, shape index: {}]   ;;  %s5313_s10 = inlined_call_operand.vmem [shape: f32[2,32,64], index: 10, kind: input, shape index: {}]   ;;  %s5314_s8 = inlined_call_operand.vmem [shape: f32[2,1,32], index: 8, kind: input, shape index: {}]   ;;  %s5315_s9 = inlined_call_operand.vmem [shape: f32[2,1,32], index: 9, kind: input, shape index: {}]   ;;  %s5316_s12 = inlined_call_operand.vmem [shape: f32[2,64,32], index: 12, kind: input, shape index: {}]   ;;  %s5317_s11 = inlined_call_operand.vmem [shape: f32[2,1,64], index: 11, kind: input, shape index: {}]   ;;  %s5318_s13 = inlined_call_operand.vmem [shape: f32[2,1,32], index: 13, kind: input, shape index: {}]   ;;  %s5319_s14 = inlined_call_operand.vmem [shape: f32[2,1,32], index: 14, kind: input, shape index: {}]   ;;  %s5320_s15 = inlined_call_operand.vmem [shape: f32[2,1,32], index: 15, kind: input, shape index: {}]   ;;  %s5321_s16 = inlined_call_operand.vmem [shape: f32[32,1], index: 16, kind: input, shape index: {}]   ;;  %s5322_s17 = inlined_call_operand.<no memory space> [shape: f32[1,1], index: 17, kind: input, shape index: {}]   ;;  %s5323_s18 = inlined_call_operand.vmem [shape: f32[2,1], index: 18, kind: output, shape index: {}]  }
   0x1   :  { %5338 = sst [smem:[#allocation3_spill]] %s5305_s0  ;;  %4499 = vset.pattern.permute.xlu0 %v4588_v0  ;;  %v3884_v10 = vld [vmem:[%s5308_s3] ss:$0 sm:$0xff]  ;;  %4131 = vmatprep.subr.mxu1 %v4589_v22  ;;  %vm192_vm2 = vcmask 64512   ;;  %s4595_s23 = smov 104   ;;  %vm866_vm3 = vcmask 130048  }
   0x2   :  { %5339 = sst [smem:[#allocation4_spill]] %s5306_s4  ;;  %s5341_s29 = sld [smem:[#allocation3_spill]]  ;;  %v91_v15 = vld [vmem:[%s5309_s1] sm:$0xff]  ;;  %4133 = vmatprep.mubr.msk.f32.mxu1 %vm4590_vm1, %v4589_v22  ;;  %vm868_vm4 = vcmask 195584   ;;  %vm1804_vm5 = vcmask 523264   ;;  %vm3791_vm6 = vcmask 1040384  }
   0x3   :  { %5340 = sst [smem:[#allocation5_spill]] %s5307_s2  ;;  %s5342_s20 = sld [smem:[#allocation4_spill]]  ;;  %v3885_v23 = vld [vmem:[%s5310_s5] ss:$0 sm:$0xff]  ;;  %vm3877_vm7 = vcmask 1024  }
   0x4   :  { %s5343_s28 = sld [smem:[#allocation5_spill]]  ;;  %s4591_s4 = smov 96  }
   0x5   :  { %s4594_s2 = smov 112   ;;  %s4596_s24 = smov 80  }
   0x6   :  { %s5334_s25 = smov 72   ;;  %s5332_s26 = smov 64  }
   0x7   :  { %s5326_s27 = smov 48   ;;  %s4602_s30 = smov 8  }
   0x8   :  { %v61_v1 = vld [vmem:[%s5341_s29] sm:$0xff]  ;;  %v62_v2 = vld [vmem:[%s5341_s29 + $0x8] sm:$0xff]  ;;  %s5328_s29 = smov 40   ;;  %s5336_s0 = smov 24  }
   0x9   :  { %66 = vperm.xlu0 %4499, %v61_v1   ;;  %v96_v3 = vld [vmem:[%s5342_s20] sm:$0xff]  ;;  %v97_v4 = vld [vmem:[%s5342_s20 + $0x8] sm:$0xff]  ;;  %v98_v6 = vld [vmem:[%s5342_s20 + $0x10] sm:$0xff]  ;;  %s5345_s3 = smov 64  }
   0xa   :  { %v4395_v5 = vpack.c.bf16 %v97_v4, %v96_v3  ;;  %v99_v7 = vld [vmem:[%s5342_s20 + $0x18] sm:$0xff]  ;;  %v3883_v9 = vld [vmem:[%s5343_s28] ss:$0 sm:$0xff]  ;;  %s5330_s28 = smov 56  }
   0xb   :  { %v4399_v8 = vpack.c.bf16 %v99_v7, %v98_v6 }
   0xc   :  { %4396 = vmatprep.subr.bf16.mxu0 %v4395_v5 }
   0xd   :  { %71 = vperm.xlu0 %4499, %v62_v2   ;;  %4398 = vmatpush3.bf16.msra.mxu0 %v4395_v5 }
   0xe   :  { %4400 = vmatprep.subr.bf16.mxu0 %v4399_v8 }
  0x11   :  { %4402 = vmatpush3.bf16.msra.mxu0 %v4399_v8 }
  0x12   :  { %4151 = vmatprep.subr.mxu0 %v4589_v22 }
  0x88   :  { %v67_v11 = vpop.permute.xlu0 %66 }
  0x89   :  { %v80_v12 = vmul.f32 %v3883_v9, %v67_v11 }
  0x8b   :  { %v89_v13 = vadd.f32 %v3884_v10, %v80_v12 }
  0x8c   :  { %v72_v14 = vpop.permute.xlu0 %71 }
  0x8d   :  { %v81_v16 = vmul.f32 %v3883_v9, %v72_v14  ;;  %v92_v17 = vmul.f32 5.656854, %v89_v13 }
  0x8f   :  { %v90_v18 = vadd.f32 %v3884_v10, %v81_v16  ;;  %v4728_v19 = vadd.f32 %v92_v17, %v91_v15 }
  0x91   :  { %v93_v20 = vmul.f32 5.656854, %v90_v18  ;;  %4128 = vmatprep.mubr.msk.f32.mxu0 %vm107_vm0, %v4728_v19 }
  0x93   :  { %v4732_v21 = vadd.f32 %v93_v20, %v91_v15 }
  0x95   :  { %4129 = vmatmul.mubr.msk.f32.vlgmr.msra.gmra.mrb[0].mxu0 %vm107_vm0, %v4732_v21 }
  0x96   :  { %4153 = vmatprep.mubr.msk.f32.mxu0 %vm4590_vm1, %v4589_v22 }
 0x168   :  { %v4130_v24 = vpop.f32.mrb[0].mxu0 }
 0x169   :  { %v4745_v25 = vadd.f32 %v4130_v24, %v3885_v23  ;;  %v180_v26 = vpop.f32.mrb[1].mxu0 }
 0x16a   :  { %v4747_v27 = vadd.f32 %v3885_v23, %v180_v26 }
 0x16c   :  { %190 = vrot.lane.b32.xlu1 %v4747_v27, %s4591_s4 }
 0x1de   :  { %v191_v28 = vpop.permute.xlu1 %190 }
 0x1df   :  { %4132 = vmatpush3.xpose.msk.msra.mxu1 %vm192_vm2, %v191_v28 }
 0x1e0   :  { %4136 = vmatprep.subr.mxu1 %v4589_v22 }
 0x1e2   :  { %4134 = vmatmul.mubr.msk.f32.vlgmr.msra.gmra.mrb[0].mxu1 %vm192_vm2, %v4747_v27 }
 0x1e3   :  { %4138 = vmatprep.mubr.msk.f32.mxu1 %vm4590_vm1, %v4589_v22 }
 0x2b5   :  { %v263_v29 = vpop.f32.mrb[0].mxu1 }
 0x2b6   :  { %v267_v30 = vmul.f32 0.35355338, %v263_v29  ;;  %v4135_v31 = vpop.f32.mrb[1].mxu1 }
 0x2b8   :  { %v268_v32 = vsel %vm192_vm2, %v267_v30, -inf }
 0x2b9   :  { %269 = vmax.xlane.f32.xlu1 %v268_v32 }
 0x2ca   :  { %357 = vrot.lane.b32.xlu1 %v4747_v27, %s4592_s21 }
 0x2ce   :  { %355 = vrot.lane.b32.xlu1 %v4747_v27, %s4593_s22 }
 0x2d2   :  { %521 = vrot.lane.b32.xlu1 %v4747_v27, %s4594_s2 }
 0x2d6   :  { %687 = vrot.lane.b32.xlu1 %v4747_v27, %s4595_s23 }
 0x2da   :  { %1037 = vrot.lane.b32.xlu1 %v4745_v25, %s4592_s21 }
 0x2de   :  { %1203 = vrot.lane.b32.xlu1 %v4745_v25, %s4596_s24 }
 0x2e2   :  { %1369 = vrot.lane.b32.xlu1 %v4745_v25, %s5334_s25 }
 0x346   :  { %v270_v33 = vpop.xlane.xlu1 %269 }
 0x347   :  { %v271_v34 = vsub.f32 %v267_v30, %v270_v33 }
 0x349   :  { %v272_v35 = vmul.f32 1.442695, %v271_v34 }
 0x34a   :  { %v358_v38 = vpop.permute.xlu1 %357 }
 0x34b   :  { %4500 = vpow2.f32 %v272_v35 }
 0x34e   :  { %v356_v39 = vpop.permute.xlu1 %355 }
 0x352   :  { %v522_v41 = vpop.permute.xlu1 %521 }
 0x355   :  { %v4501_v36 = vpop.eup %4500 }
 0x356   :  { %v274_v37 = vsel %vm192_vm2, %v4501_v36, 0.0  ;;  %v688_v44 = vpop.permute.xlu1 %687 }
 0x357   :  { %275 = vadd.xlane.f32.xlu0 %v274_v37 }
 0x35a   :  { %v1038_v48 = vpop.permute.xlu1 %1037 }
 0x35e   :  { %v1204_v51 = vpop.permute.xlu1 %1203 }
 0x362   :  { %v1370_v53 = vpop.permute.xlu1 %1369 }
 0x36d   :  { %279 = vrot.lane.b32.xlu0 %v4747_v27, %s5332_s26 }
 0x371   :  { %523 = vrot.lane.b32.xlu0 %v4747_v27, %s4596_s24 }
 0x375   :  { %689 = vrot.lane.b32.xlu0 %v4747_v27, %s5334_s25 }
 0x379   :  { %871 = vrot.lane.b32.xlu0 %v4745_v25, %s4591_s4 }
 0x37d   :  { %1035 = vrot.lane.b32.xlu0 %v4745_v25, %s4593_s22 }
 0x381   :  { %1201 = vrot.lane.b32.xlu0 %v4745_v25, %s4594_s2 }
 0x385   :  { %1367 = vrot.lane.b32.xlu0 %v4745_v25, %s4595_s23 }
 0x3e4   :  { %v276_v40 = vpop.xlane.xlu0 %275 }
 0x3e5   :  { %4502 = vrcp.f32 %v276_v40 }
 0x3e8   :  { %v280_v42 = vpop.permute.xlu0 %279 }
 0x3e9   :  { %4137 = vmatpush3.msra.mxu1 %v280_v42 }
 0x3ea   :  { %4141 = vmatprep.subr.mxu1 %v4589_v22 }
 0x3ec   :  { %v524_v43 = vpop.permute.xlu0 %523 }
 0x3ed   :  { %4152 = vmatpush3.xpose.msk.msra.mxu0 %vm192_vm2, %v524_v43 }
 0x3ee   :  { %4161 = vmatprep.subr.mxu0 %v4589_v22 }
 0x3ef   :  { %v4503_v45 = vpop.eup %4502 }
 0x3f0   :  { %v690_v46 = vpop.permute.xlu0 %689  ;;  %4154 = vmatmul.mubr.msk.f32.vlgmr.msra.gmra.mrb[2].mxu0 %vm192_vm2, %v522_v41  ;;  %v278_v47 = vmul.f32 %v4503_v45, %v4501_v36 }
 0x3f1   :  { %4162 = vmatpush3.xpose.msk.msra.mxu0 %vm192_vm2, %v690_v46  ;;  %4163 = vmatprep.mubr.msk.f32.mxu0 %vm4590_vm1, %v4589_v22 }
 0x3f2   :  { %4139 = vmatmul.mubr.msk.f32.vlgmr.msra.gmra.mrb[2].mxu1 %vm192_vm2, %v278_v47  ;;  %4171 = vmatprep.subr.mxu0 %v4589_v22 }
 0x3f3   :  { %4142 = vmatpush3.xpose.msk.msra.mxu1 %vm192_vm2, %v358_v38  ;;  %4143 = vmatprep.mubr.msk.f32.mxu1 %vm4590_vm1, %v4589_v22 }
 0x3f4   :  { %v872_v49 = vpop.permute.xlu0 %871  ;;  %4164 = vmatmul.mubr.msk.f32.vlgmr.msra.gmra.mrb[4].mxu0 %vm192_vm2, %v688_v44  ;;  %4146 = vmatprep.subr.mxu1 %v4589_v22 }
 0x3f5   :  { %4172 = vmatpush3.xpose.msk.msra.mxu0 %vm192_vm2, %v872_v49  ;;  %4173 = vmatprep.mubr.msk.f32.mxu0 %vm4590_vm1, %v4589_v22 }
 0x3f6   :  { %4144 = vmatmul.mubr.msk.f32.vlgmr.msra.gmra.mrb[4].mxu1 %vm192_vm2, %v356_v39  ;;  %4181 = vmatprep.subr.mxu0 %v4589_v22 }
 0x3f7   :  { %4148 = vmatprep.mubr.msk.f32.mxu1 %vm4590_vm1, %v4589_v22 }
 0x3f8   :  { %v1036_v50 = vpop.permute.xlu0 %1035  ;;  %4174 = vmatmul.mubr.msk.f32.vlgmr.msra.gmra.mrb[6].mxu0 %vm192_vm2, %v4745_v25 }
 0x3f9   :  { %4182 = vmatpush3.xpose.msk.msra.mxu0 %vm192_vm2, %v1038_v48  ;;  %4183 = vmatprep.mubr.msk.f32.mxu0 %vm4590_vm1, %v4589_v22 }
 0x3fa   :  { %4191 = vmatprep.subr.mxu0 %v4589_v22 }
 0x3fc   :  { %4184 = vmatmul.mubr.msk.f32.vlgmr.msra.gmra.mrb[8].mxu0 %vm192_vm2, %v1036_v50  ;;  %v1202_v52 = vpop.permute.xlu0 %1201 }
 0x3fd   :  { %4192 = vmatpush3.xpose.msk.msra.mxu0 %vm192_vm2, %v1204_v51  ;;  %4193 = vmatprep.mubr.msk.f32.mxu0 %vm4590_vm1, %v4589_v22 }
 0x3fe   :  { %4201 = vmatprep.subr.mxu0 %v4589_v22 }
 0x400   :  { %4194 = vmatmul.mubr.msk.f32.vlgmr.msra.gmra.mrb[10].mxu0 %vm192_vm2, %v1202_v52  ;;  %v1368_v54 = vpop.permute.xlu0 %1367 }
 0x401   :  { %4202 = vmatpush3.xpose.msk.msra.mxu0 %vm192_vm2, %v1370_v53  ;;  %4203 = vmatprep.mubr.msk.f32.mxu0 %vm4590_vm1, %v4589_v22 }
 0x404   :  { %4204 = vmatmul.mubr.msk.f32.vlgmr.msra.gmra.mrb[12].mxu0 %vm192_vm2, %v1368_v54 }
 0x4c3   :  { %v595_v55 = vpop.f32.mrb[2].mxu0 }
 0x4c4   :  { %v599_v56 = vmul.f32 0.35355338, %v595_v55  ;;  %v4155_v57 = vpop.f32.mrb[3].mxu0 }
 0x4c5   :  { %v4824_v58 = vpop.f32.mrb[2].mxu1 }
 0x4c6   :  { %v4140_v59 = vpop.f32.mrb[3].mxu1  ;;  %v600_v60 = vsel %vm192_vm2, %v599_v56, -inf }
 0x4c7   :  { %601 = vmax.xlane.f32.xlu0 %v600_v60  ;;  %v761_v61 = vpop.f32.mrb[4].mxu0 }
 0x4c8   :  { %v765_v62 = vmul.f32 0.35355338, %v761_v61  ;;  %v4165_v63 = vpop.f32.mrb[5].mxu0 }
 0x4c9   :  { %v429_v0 = vpop.f32.mrb[4].mxu1 }
 0x4ca   :  { %v4827_v1 = vmul.f32 0.35355338, %v429_v0  ;;  %v4145_v2 = vpop.f32.mrb[5].mxu1  ;;  %v766_v3 = vsel %vm192_vm2, %v765_v62, -inf }
 0x4cb   :  { %767 = vmax.xlane.f32.xlu0 %v766_v3  ;;  %v943_v4 = vpop.f32.mrb[6].mxu0 }
 0x4cc   :  { %v947_v5 = vmul.f32 0.35355338, %v943_v4  ;;  %v4175_v6 = vpop.f32.mrb[7].mxu0  ;;  %v434_v7 = vsel %vm192_vm2, %v4827_v1, -inf }
 0x4cd   :  { %435 = vmax.xlane.f32.xlu1 %v434_v7 }
 0x4ce   :  { %v948_v11 = vsel %vm192_vm2, %v947_v5, -inf }
 0x4cf   :  { %v1109_v8 = vpop.f32.mrb[8].mxu0 }
 0x4d0   :  { %v1113_v9 = vmul.f32 0.35355338, %v1109_v8  ;;  %v4185_v10 = vpop.f32.mrb[9].mxu0 }
 0x4d1   :  { %949 = vmax.xlane.f32.xlu1 %v948_v11 }
 0x4d2   :  { %v1114_v12 = vsel %vm192_vm2, %v1113_v9, -inf }
 0x4d3   :  { %1115 = vmax.xlane.f32.xlu0 %v1114_v12  ;;  %v1275_v13 = vpop.f32.mrb[10].mxu0 }
 0x4d4   :  { %v1279_v14 = vmul.f32 0.35355338, %v1275_v13  ;;  %v4195_v15 = vpop.f32.mrb[11].mxu0 }
 0x4d6   :  { %v1280_v16 = vsel %vm192_vm2, %v1279_v14, -inf }
 0x4d7   :  { %v1441_v17 = vpop.f32.mrb[12].mxu0  ;;  %1281 = vmax.xlane.f32.xlu1 %v1280_v16 }
 0x4d8   :  { %v1445_v18 = vmul.f32 0.35355338, %v1441_v17  ;;  %v4205_v20 = vpop.f32.mrb[13].mxu0 }
 0x4da   :  { %v1446_v23 = vsel %vm192_vm2, %v1445_v18, -inf }
 0x4db   :  { %1447 = vmax.xlane.f32.xlu0 %v1446_v23 }
 0x554   :  { %v602_v24 = vpop.xlane.xlu0 %601 }
 0x555   :  { %v603_v26 = vsub.f32 %v599_v56, %v602_v24 }
 0x557   :  { %v604_v28 = vmul.f32 1.442695, %v603_v26 }
 0x558   :  { %v768_v29 = vpop.xlane.xlu0 %767 }
 0x559   :  { %4504 = vpow2.f32 %v604_v28  ;;  %v769_v30 = vsub.f32 %v765_v62, %v768_v29 }
 0x55a   :  { %v436_v31 = vpop.xlane.xlu1 %435 }
 0x55b   :  { %v770_v32 = vmul.f32 1.442695, %v769_v30  ;;  %v437_v57 = vsub.f32 %v4827_v1, %v436_v31  ;;  %v1548_v31 = vld [vmem:[%s5311_s6] sm:$0xff] }
 0x55d   :  { %4506 = vpow2.f32 %v770_v32  ;;  %v438_v59 = vmul.f32 1.442695, %v437_v57  ;;  %v1549_v32 = vld [vmem:[%s5311_s6 + $0x8] sm:$0xff] }
 0x55e   :  { %v950_v33 = vpop.xlane.xlu1 %949 }
 0x55f   :  { %v951_v34 = vsub.f32 %v947_v5, %v950_v33 }
 0x560   :  { %v1116_v35 = vpop.xlane.xlu0 %1115 }
 0x561   :  { %v952_v36 = vmul.f32 1.442695, %v951_v34  ;;  %v1117_v37 = vsub.f32 %v1113_v9, %v1116_v35  ;;  %v4403_v34 = vpack.c.bf16 %v1549_v32, %v1548_v31  ;;  %v3916_v32 = vld [vmem:[%s5315_s9] ss:$0 sm:$0xff] }
 0x563   :  { %v4836_v38 = vpop.eup %4504  ;;  %4508 = vpow2.f32 %v952_v36  ;;  %v1118_v39 = vmul.f32 1.442695, %v1117_v37  ;;  %4404 = vmatprep.subr.bf16.mxu0 %v4403_v34  ;;  %v1550_v36 = vld [vmem:[%s5311_s6 + $0x10] sm:$0xff]  ;;  %v1551_v37 = vld [vmem:[%s5311_s6 + $0x18] sm:$0xff] }
 0x564   :  { %v1282_v40 = vpop.xlane.xlu1 %1281  ;;  %v606_v41 = vsel %vm192_vm2, %v4836_v38, 0.0  ;;  %4406 = vmatpush3.bf16.msra.mxu0 %v4403_v34 }
 0x565   :  { %4510 = vpow2.f32 %v1118_v39  ;;  %v1283_v42 = vsub.f32 %v1279_v14, %v1282_v40  ;;  %607 = vadd.xlane.f32.xlu0 %v606_v41  ;;  %v4407_v39 = vpack.c.bf16 %v1551_v37, %v1550_v36 }
 0x567   :  { %v4840_v43 = vpop.eup %4506  ;;  %v1284_v44 = vmul.f32 1.442695, %v1283_v42  ;;  %4408 = vmatprep.subr.bf16.mxu0 %v4407_v39 }
 0x568   :  { %v1448_v45 = vpop.xlane.xlu0 %1447  ;;  %v772_v46 = vsel %vm192_vm2, %v4840_v43, 0.0  ;;  %4410 = vmatpush3.bf16.msra.mxu0 %v4407_v39  ;;  %v1789_v39 = vld [vmem:[%s5316_s12] sm:$0xff] }
 0x569   :  { %4512 = vpow2.f32 %v1284_v44  ;;  %v1449_v47 = vsub.f32 %v1445_v18, %v1448_v45  ;;  %773 = vadd.xlane.f32.xlu1 %v772_v46 }
 0x56b   :  { %v1450_v48 = vmul.f32 1.442695, %v1449_v47 }
 0x56d   :  { %v4844_v49 = vpop.eup %4508  ;;  %4514 = vpow2.f32 %v1450_v48 }
 0x56e   :  { %v954_v50 = vsel %vm192_vm2, %v4844_v49, 0.0  ;;  %4516 = vpow2.f32 %v438_v59 }
 0x56f   :  { %v4848_v51 = vpop.eup %4510  ;;  %955 = vadd.xlane.f32.xlu0 %v954_v50 }
 0x570   :  { %v1120_v52 = vsel %vm192_vm2, %v4848_v51, 0.0 }
 0x571   :  { %1121 = vadd.xlane.f32.xlu1 %v1120_v52 }
 0x573   :  { %v4852_v53 = vpop.eup %4512 }
 0x574   :  { %v1286_v54 = vsel %vm192_vm2, %v4852_v53, 0.0 }
 0x575   :  { %1287 = vadd.xlane.f32.xlu0 %v1286_v54 }
 0x577   :  { %v4856_v55 = vpop.eup %4514 }
 0x578   :  { %v1452_v56 = vsel %vm192_vm2, %v4856_v55, 0.0  ;;  %v4517_v60 = vpop.eup %4516 }
 0x579   :  { %1453 = vadd.xlane.f32.xlu1 %v1452_v56  ;;  %v440_v61 = vsel %vm192_vm2, %v4517_v60, 0.0 }
 0x58a   :  { %611 = vrot.lane.b32.xlu1 %v4747_v27, %s5326_s27 }
 0x58b   :  { %445 = vrot.lane.b32.xlu0 %v4747_v27, %s5330_s28 }
 0x58f   :  { %959 = vrot.lane.b32.xlu0 %v4745_v25, %s5332_s26 }
 0x593   :  { %1291 = vrot.lane.b32.xlu0 %v4745_v25, %s5326_s27  ;;  %s4603_s27 = smov 16  }
 0x5ae   :  { %441 = vadd.xlane.f32.xlu1 %v440_v61 }
 0x5bf   :  { %777 = vrot.lane.b32.xlu1 %v4747_v27, %s5328_s29 }
 0x5c3   :  { %1125 = vrot.lane.b32.xlu1 %v4745_v25, %s5330_s28 }
 0x5c7   :  { %1457 = vrot.lane.b32.xlu1 %v4745_v25, %s5328_s29 }
 0x5f2   :  { %v608_v62 = vpop.xlane.xlu0 %607 }
 0x5f6   :  { %v774_v2 = vpop.xlane.xlu1 %773 }
 0x5fc   :  { %v956_v63 = vpop.xlane.xlu0 %955 }
 0x5fe   :  { %v1122_v3 = vpop.xlane.xlu1 %1121 }
 0x602   :  { %v1288_v0 = vpop.xlane.xlu0 %1287 }
 0x606   :  { %v446_v1 = vpop.permute.xlu0 %445  ;;  %v1454_v4 = vpop.xlane.xlu1 %1453 }
 0x607   :  { %4147 = vmatpush3.msra.mxu1 %v446_v1 }
 0x608   :  { %4156 = vmatprep.subr.mxu1 %v4589_v22 }
 0x60a   :  { %v612_v5 = vpop.permute.xlu1 %611  ;;  %v960_v13 = vpop.permute.xlu0 %959 }
 0x60e   :  { %v1292_v20 = vpop.permute.xlu0 %1291 }
 0x63b   :  { %v442_v6 = vpop.xlane.xlu1 %441 }
 0x63c   :  { %4518 = vrcp.f32 %v442_v6 }
 0x63d   :  { %4520 = vrcp.f32 %v608_v62 }
 0x63e   :  { %4522 = vrcp.f32 %v774_v2 }
 0x63f   :  { %4524 = vrcp.f32 %v956_v63  ;;  %v778_v10 = vpop.permute.xlu1 %777 }
 0x640   :  { %4526 = vrcp.f32 %v1122_v3 }
 0x641   :  { %4528 = vrcp.f32 %v1288_v0 }
 0x642   :  { %4530 = vrcp.f32 %v1454_v4 }
 0x643   :  { %v1126_v16 = vpop.permute.xlu1 %1125 }
 0x646   :  { %v4519_v27 = vpop.eup %4518 }
 0x647   :  { %v444_v7 = vmul.f32 %v4519_v27, %v4517_v60  ;;  %v4521_v8 = vpop.eup %4520  ;;  %v1458_v26 = vpop.permute.xlu1 %1457 }
 0x648   :  { %v610_v25 = vmul.f32 %v4521_v8, %v4836_v38  ;;  %v4523_v9 = vpop.eup %4522 }
 0x649   :  { %4149 = vmatmul.mubr.msk.f32.vlgmr.msra.gmra.mrb[6].mxu1 %vm192_vm2, %v444_v7  ;;  %v776_v11 = vmul.f32 %v4523_v9, %v4840_v43  ;;  %v4525_v12 = vpop.eup %4524 }
 0x64a   :  { %4157 = vmatpush3.msra.mxu1 %v612_v5  ;;  %4158 = vmatprep.mubr.msk.f32.mxu1 %vm4590_vm1, %v4589_v22  ;;  %v958_v14 = vmul.f32 %v4525_v12, %v4844_v49  ;;  %v4527_v15 = vpop.eup %4526 }
 0x64b   :  { %4166 = vmatprep.subr.mxu1 %v4589_v22  ;;  %v1124_v17 = vmul.f32 %v4527_v15, %v4848_v51  ;;  %v4529_v18 = vpop.eup %4528  ;;  %v1689_v15 = vld [vmem:[%s5313_s10 + $0x10] sm:$0xff] }
 0x64c   :  { %v1290_v23 = vmul.f32 %v4529_v18, %v4852_v53  ;;  %v4531_v24 = vpop.eup %4530 }
 0x64d   :  { %4159 = vmatmul.mubr.msk.f32.vlgmr.msra.gmra.mrb[8].mxu1 %vm192_vm2, %v610_v25  ;;  %v1456_v28 = vmul.f32 %v4531_v24, %v4856_v55 }
 0x64e   :  { %4167 = vmatpush3.msra.mxu1 %v778_v10  ;;  %4168 = vmatprep.mubr.msk.f32.mxu1 %vm4590_vm1, %v4589_v22 }
 0x64f   :  { %4176 = vmatprep.subr.mxu1 %v4589_v22 }
 0x651   :  { %4169 = vmatmul.mubr.msk.f32.vlgmr.msra.gmra.mrb[10].mxu1 %vm192_vm2, %v776_v11 }
 0x652   :  { %4177 = vmatpush3.msra.mxu1 %v960_v13  ;;  %4178 = vmatprep.mubr.msk.f32.mxu1 %vm4590_vm1, %v4589_v22  ;;  %v1688_v13 = vld [vmem:[%s5313_s10 + $0x8] sm:$0xff] }
 0x653   :  { %4186 = vmatprep.subr.mxu1 %v4589_v22 }
 0x655   :  { %4179 = vmatmul.mubr.msk.f32.vlgmr.msra.gmra.mrb[12].mxu1 %vm192_vm2, %v958_v14 }
 0x656   :  { %4187 = vmatpush3.msra.mxu1 %v1126_v16  ;;  %4188 = vmatprep.mubr.msk.f32.mxu1 %vm4590_vm1, %v4589_v22  ;;  %v1690_v16 = vld [vmem:[%s5313_s10 + $0x18] sm:$0xff] }
 0x657   :  { %4196 = vmatprep.subr.mxu1 %v4589_v22 }
 0x659   :  { %4189 = vmatmul.mubr.msk.f32.vlgmr.msra.gmra.mrb[14].mxu1 %vm192_vm2, %v1124_v17  ;;  %v4415_v17 = vpack.c.bf16 %v1690_v16, %v1689_v15 }
 0x65a   :  { %4197 = vmatpush3.msra.mxu1 %v1292_v20  ;;  %4198 = vmatprep.mubr.msk.f32.mxu1 %vm4590_vm1, %v4589_v22 }
 0x65b   :  { %4206 = vmatprep.subr.mxu1 %v4589_v22 }
 0x65d   :  { %4199 = vmatmul.mubr.msk.f32.vlgmr.msra.gmra.mrb[16].mxu1 %vm192_vm2, %v1290_v23 }
 0x65e   :  { %4207 = vmatpush3.msra.mxu1 %v1458_v26  ;;  %4208 = vmatprep.mubr.msk.f32.mxu1 %vm4590_vm1, %v4589_v22 }
 0x661   :  { %4209 = vmatmul.mubr.msk.f32.vlgmr.msra.gmra.mrb[18].mxu1 %vm192_vm2, %v1456_v28 }
 0x71c   :  { %v517_v29 = vpop.f32.mrb[6].mxu1 }
 0x71d   :  { %854 = vrot.lane.b32.xlu0 %v517_v29, %s4602_s30  ;;  %v4150_v30 = vpop.f32.mrb[7].mxu1 }
 0x71e   :  { %v3915_v30 = vld [vmem:[%s5314_s8] ss:$0 sm:$0xff] }
 0x720   :  { %v683_v33 = vpop.f32.mrb[8].mxu1 }
 0x721   :  { %858 = vrot.lane.b32.xlu1 %v683_v33, %s4603_s27  ;;  %v4160_v35 = vpop.f32.mrb[9].mxu1 }
 0x724   :  { %v849_v38 = vpop.f32.mrb[10].mxu1 }
 0x725   :  { %862 = vrot.lane.b32.xlu1 %v849_v38, %s5336_s0  ;;  %v4170_v40 = vpop.f32.mrb[11].mxu1 }
 0x726   :  { %v1790_v40 = vld [vmem:[%s5316_s12 + $0x8] sm:$0xff] }
 0x728   :  { %v1031_v41 = vpop.f32.mrb[12].mxu1 }
 0x729   :  { %v4180_v42 = vpop.f32.mrb[13].mxu1 }
 0x72a   :  { %v1791_v42 = vld [vmem:[%s5316_s12 + $0x10] sm:$0xff] }
 0x72c   :  { %v1197_v43 = vpop.f32.mrb[14].mxu1 }
 0x72d   :  { %1534 = vrot.lane.b32.xlu0 %v1197_v43, %s4602_s30  ;;  %v4190_v44 = vpop.f32.mrb[15].mxu1  ;;  %v1792_v43 = vld [vmem:[%s5316_s12 + $0x18] sm:$0xff] }
 0x72e   :  { %v4423_v44 = vpack.c.bf16 %v1792_v43, %v1791_v42 }
 0x730   :  { %v1363_v45 = vpop.f32.mrb[16].mxu1 }
 0x731   :  { %1538 = vrot.lane.b32.xlu0 %v1363_v45, %s4603_s27  ;;  %v4200_v46 = vpop.f32.mrb[17].mxu1  ;;  %v1793_v45 = vld [vmem:[%s5316_s12 + $0x20] sm:$0xff] }
 0x732   :  { %v1794_v46 = vld [vmem:[%s5316_s12 + $0x28] sm:$0xff] }
 0x734   :  { %v1529_v47 = vpop.f32.mrb[18].mxu1 }
 0x735   :  { %1542 = vrot.lane.b32.xlu1 %v1529_v47, %s5336_s0  ;;  %v4210_v48 = vpop.f32.mrb[19].mxu1  ;;  %v4427_v47 = vpack.c.bf16 %v1794_v46, %v1793_v45 }
 0x736   :  { %v1795_v48 = vld [vmem:[%s5316_s12 + $0x30] sm:$0xff] }
 0x78f   :  { %v855_v49 = vpop.permute.xlu0 %854 }
 0x790   :  { %v865_v51 = vsel %vm192_vm2, %v4824_v58, %v855_v49  ;;  %v3912_v58 = vld [vmem:[%s5312_s7] ss:$0 sm:$0xff]  ;;  %v1796_v49 = vld [vmem:[%s5316_s12 + $0x38] sm:$0xff] }
 0x793   :  { %v859_v50 = vpop.permute.xlu1 %858 }
 0x794   :  { %v867_v52 = vsel %vm866_vm3, %v865_v51, %v859_v50  ;;  %v4431_v50 = vpack.c.bf16 %v1796_v49, %v1795_v48  ;;  %v3917_v51 = vld [vmem:[%s5317_s11] ss:$0 sm:$0xff] }
 0x797   :  { %v863_v53 = vpop.permute.xlu1 %862 }
 0x798   :  { %v869_v54 = vsel %vm868_vm4, %v867_v52, %v863_v53 }
 0x799   :  { %4219 = vmatprep.mubr.msk.f32.mxu0 %vm107_vm0, %v869_v54 }
 0x79f   :  { %v1535_v55 = vpop.permute.xlu0 %1534 }
 0x7a0   :  { %v1545_v57 = vsel %vm192_vm2, %v1031_v41, %v1535_v55  ;;  %v4419_v41 = vpack.c.bf16 %v1790_v40, %v1789_v39  ;;  %v3924_v39 = vld [vmem:[%s5320_s15] ss:$0 sm:$0xff] }
 0x7a2   :  { %4420 = vmatprep.subr.bf16.mxu0 %v4419_v41 }
 0x7a3   :  { %v1539_v56 = vpop.permute.xlu0 %1538 }
 0x7a4   :  { %v1546_v59 = vsel %vm866_vm3, %v1545_v57, %v1539_v56 }
 0x7a7   :  { %v1543_v60 = vpop.permute.xlu1 %1542 }
 0x7a8   :  { %v1547_v61 = vsel %vm868_vm4, %v1546_v59, %v1543_v60 }
 0x7a9   :  { %4220 = vmatmul.mubr.msk.f32.vlgmr.msra.gmra.mrb[14].mxu0 %vm107_vm0, %v1547_v61 }
 0x7aa   :  { %4422 = vmatpush3.bf16.msra.mxu0 %v4419_v41 }
 0x7ab   :  { %4424 = vmatprep.subr.bf16.mxu0 %v4423_v44 }
 0x7ae   :  { %4426 = vmatpush3.bf16.msra.mxu0 %v4423_v44  ;;  %v3930_v44 = vld [vmem:[%s5310_s5 + $0x1] ss:$0 sm:$0xff]  ;;  %s5344_s5 = smov 72  }
 0x7af   :  { %4428 = vmatprep.subr.bf16.mxu0 %v4427_v47 }
 0x7b2   :  { %4430 = vmatpush3.bf16.msra.mxu0 %v4427_v47 }
 0x7b3   :  { %4432 = vmatprep.subr.bf16.mxu0 %v4431_v50 }
 0x7b6   :  { %4434 = vmatpush3.bf16.msra.mxu0 %v4431_v50 }
 0x7b7   :  { %4273 = vmatprep.subr.mxu0 %v4589_v22 }
 0x87c   :  { %v4221_v62 = vpop.f32.mrb[14].mxu0 }
 0x87d   :  { %v1637_v63 = vadd.f32 %v4221_v62, %v3912_v58  ;;  %v1631_v0 = vpop.f32.mrb[15].mxu0 }
 0x87e   :  { %v1632_v1 = vadd.f32 %v3912_v58, %v1631_v0 }
 0x87f   :  { %v1641_v2 = vadd.f32 %v1637_v63, %v4732_v21 }
 0x880   :  { %v1640_v3 = vadd.f32 %v1632_v1, %v4728_v19  ;;  %v1687_v19 = vld [vmem:[%s5313_s10] sm:$0xff] }
 0x881   :  { %v1647_v4 = vsel %vm107_vm0, %v1641_v2, 0.0  ;;  %v4411_v14 = vpack.c.bf16 %v1688_v13, %v1687_v19 }
 0x882   :  { %1648 = vadd.xlane.f32.xlu1 %v1647_v4  ;;  %v1644_v5 = vsel %vm107_vm0, %v1640_v3, 0.0 }
 0x883   :  { %1645 = vadd.xlane.f32.xlu0 %v1644_v5  ;;  %4412 = vmatprep.subr.bf16.mxu1 %v4411_v14 }
 0x884   :  { %4414 = vmatpush3.bf16.msra.mxu1 %v4411_v14 }
 0x885   :  { %4416 = vmatprep.subr.bf16.mxu1 %v4415_v17 }
 0x888   :  { %4418 = vmatpush3.bf16.msra.mxu1 %v4415_v17  ;;  %v3925_v17 = vld [vmem:[%s5342_s20 + $0x20] sm:$0xff] }
 0x90f   :  { %v1649_v6 = vpop.xlane.xlu1 %1648 }
 0x910   :  { %v1652_v27 = vmul.f32 0.03125, %v1649_v6  ;;  %v1646_v7 = vpop.xlane.xlu0 %1645 }
 0x911   :  { %v1651_v8 = vmul.f32 0.03125, %v1646_v7 }
 0x912   :  { %v1654_v25 = vsub.f32 %v1641_v2, %v1652_v27  ;;  %v3920_v2 = vld [vmem:[%s5318_s13] ss:$0 sm:$0xff] }
 0x913   :  { %v1653_v9 = vsub.f32 %v1640_v3, %v1651_v8 }
 0x914   :  { %v1656_v12 = vmul.f32 %v1654_v25, %v1654_v25 }
 0x915   :  { %v1655_v10 = vmul.f32 %v1653_v9, %v1653_v9 }
 0x916   :  { %v1660_v21 = vsel %vm107_vm0, %v1656_v12, 0.0 }
 0x917   :  { %v1657_v11 = vsel %vm107_vm0, %v1655_v10, 0.0 }
 0x918   :  { %1658 = vadd.xlane.f32.xlu0 %v1657_v11 }
 0x91c   :  { %1661 = vadd.xlane.f32.xlu0 %v1660_v21 }
 0x9a5   :  { %v1659_v18 = vpop.xlane.xlu0 %1658 }
 0x9a6   :  { %v1663_v20 = vmul.f32 0.03125, %v1659_v18  ;;  %v3926_v18 = vld [vmem:[%s5342_s20 + $0x28] sm:$0xff] }
 0x9a8   :  { %v1665_v23 = vadd.f32 1e-12, %v1663_v20  ;;  %v4435_v20 = vpack.c.bf16 %v3926_v18, %v3925_v17 }
 0x9a9   :  { %v1662_v24 = vpop.xlane.xlu0 %1661 }
 0x9aa   :  { %4532 = vrsqrt.f32 %v1665_v23  ;;  %v1664_v26 = vmul.f32 0.03125, %v1662_v24  ;;  %v3927_v23 = vld [vmem:[%s5342_s20 + $0x30] sm:$0xff]  ;;  %v3928_v24 = vld [vmem:[%s5342_s20 + $0x38] sm:$0xff]  ;;  %4436 = vmatprep.subr.bf16.mxu1 %v4435_v20 }
 0x9ac   :  { %v1666_v28 = vadd.f32 1e-12, %v1664_v26  ;;  %v4439_v26 = vpack.c.bf16 %v3928_v24, %v3927_v23 }
 0x9ae   :  { %4534 = vrsqrt.f32 %v1666_v28 }
 0x9b4   :  { %v4533_v29 = vpop.eup %4532 }
 0x9b5   :  { %v1669_v31 = vmul.f32 %v4533_v29, %v1653_v9 }
 0x9b7   :  { %v1677_v33 = vmul.f32 %v3915_v30, %v1669_v31 }
 0x9b8   :  { %v4535_v34 = vpop.eup %4534 }
 0x9b9   :  { %v1670_v35 = vmul.f32 %v4535_v34, %v1654_v25  ;;  %v1685_v36 = vadd.f32 %v3916_v32, %v1677_v33 }
 0x9bb   :  { %v1678_v37 = vmul.f32 %v3915_v30, %v1670_v35  ;;  %4230 = vmatprep.mubr.msk.f32.mxu1 %vm107_vm0, %v1685_v36  ;;  %v3923_v35 = vld [vmem:[%s5319_s14] ss:$0 sm:$0xff] }
 0x9bd   :  { %v1686_v38 = vadd.f32 %v3916_v32, %v1678_v37 }
 0x9bf   :  { %4231 = vmatmul.mubr.msk.f32.vlgmr.msra.gmra.mrb[20].mxu1 %vm107_vm0, %v1686_v38 }
 0x9c0   :  { %4438 = vmatpush3.bf16.msra.mxu1 %v4435_v20 }
 0x9c1   :  { %4440 = vmatprep.subr.bf16.mxu1 %v4439_v26 }
 0x9c4   :  { %4442 = vmatpush3.bf16.msra.mxu1 %v4439_v26 }
 0x9c5   :  { %4263 = vmatprep.subr.mxu1 %v4589_v22 }
 0xa92   :  { %v4232_v52 = vpop.f32.mrb[20].mxu1 }
 0xa93   :  { %v1776_v53 = vadd.f32 %v4232_v52, %v3917_v51  ;;  %v1770_v54 = vpop.f32.mrb[21].mxu1 }
 0xa94   :  { %v1771_v55 = vadd.f32 %v3917_v51, %v1770_v54 }
 0xa95   :  { %v1782_v56 = vmul.f32 0.70710677, %v1776_v53  ;;  %v1780_v63 = vmul.f32 0.5, %v1776_v53 }
 0xa96   :  { %v1781_v57 = vmul.f32 0.70710677, %v1771_v55  ;;  %v1779_v58 = vmul.f32 0.5, %v1771_v55 }
 0xa97   :  { %4536 = verf.f32 %v1782_v56 }
 0xa98   :  { %4538 = verf.f32 %v1781_v57 }
 0xaa1   :  { %v4537_v59 = vpop.eup %4536 }
 0xaa2   :  { %v4539_v60 = vpop.eup %4538  ;;  %v1786_v61 = vadd.f32 1.0, %v4537_v59 }
 0xaa3   :  { %v1785_v62 = vadd.f32 1.0, %v4539_v60 }
 0xaa4   :  { %v1788_v1 = vmul.f32 %v1786_v61, %v1780_v63 }
 0xaa5   :  { %v1787_v0 = vmul.f32 %v1785_v62, %v1779_v58 }
 0xaa7   :  { %4249 = vmatprep.mubr.msk.f32.mxu0 %vm1804_vm5, %v1787_v0 }
 0xaa8   :  { %4250 = vmatmul.mubr.msk.f32.vlgmr.msra.gmra.mrb[16].mxu0 %vm1804_vm5, %v1788_v1 }
 0xaa9   :  { %4275 = vmatprep.mubr.msk.f32.mxu0 %vm4590_vm1, %v4589_v22 }
 0xb7b   :  { %v4251_v3 = vpop.f32.mrb[16].mxu0 }
 0xb7c   :  { %v1883_v4 = vadd.f32 %v4251_v3, %v3920_v2  ;;  %v1877_v5 = vpop.f32.mrb[17].mxu0 }
 0xb7d   :  { %v1878_v6 = vadd.f32 %v3920_v2, %v1877_v5 }
 0xb7e   :  { %v1887_v27 = vadd.f32 %v1883_v4, %v1686_v38 }
 0xb7f   :  { %v1886_v7 = vadd.f32 %v1878_v6, %v1685_v36 }
 0xb80   :  { %v1893_v8 = vsel %vm107_vm0, %v1887_v27, 0.0 }
 0xb81   :  { %1894 = vadd.xlane.f32.xlu0 %v1893_v8  ;;  %v1890_v25 = vsel %vm107_vm0, %v1886_v7, 0.0 }
 0xb82   :  { %1891 = vadd.xlane.f32.xlu1 %v1890_v25 }
 0xc0e   :  { %v1895_v9 = vpop.xlane.xlu0 %1894 }
 0xc0f   :  { %v1897_v10 = vmul.f32 0.03125, %v1895_v9  ;;  %v1892_v11 = vpop.xlane.xlu1 %1891 }
 0xc10   :  { %v1896_v12 = vmul.f32 0.03125, %v1892_v11 }
 0xc11   :  { %v1899_v21 = vsub.f32 %v1887_v27, %v1897_v10 }
 0xc12   :  { %v1898_v19 = vsub.f32 %v1886_v7, %v1896_v12 }
 0xc13   :  { %v1901_v13 = vmul.f32 %v1899_v21, %v1899_v21 }
 0xc14   :  { %v1900_v14 = vmul.f32 %v1898_v19, %v1898_v19 }
 0xc15   :  { %v1905_v15 = vsel %vm107_vm0, %v1901_v13, 0.0 }
 0xc16   :  { %1906 = vadd.xlane.f32.xlu0 %v1905_v15  ;;  %v1902_v16 = vsel %vm107_vm0, %v1900_v14, 0.0 }
 0xc17   :  { %1903 = vadd.xlane.f32.xlu1 %v1902_v16 }
 0xca3   :  { %v1907_v28 = vpop.xlane.xlu0 %1906 }
 0xca4   :  { %v1909_v29 = vmul.f32 0.03125, %v1907_v28  ;;  %v1904_v30 = vpop.xlane.xlu1 %1903 }
 0xca5   :  { %v1908_v31 = vmul.f32 0.03125, %v1904_v30 }
 0xca6   :  { %v1911_v32 = vadd.f32 1e-12, %v1909_v29 }
 0xca7   :  { %v1910_v33 = vadd.f32 1e-12, %v1908_v31 }
 0xca8   :  { %4540 = vrsqrt.f32 %v1911_v32 }
 0xca9   :  { %4542 = vrsqrt.f32 %v1910_v33 }
 0xcb2   :  { %v4541_v34 = vpop.eup %4540 }
 0xcb3   :  { %v4543_v36 = vpop.eup %4542  ;;  %v1915_v37 = vmul.f32 %v4541_v34, %v1899_v21 }
 0xcb4   :  { %v1914_v38 = vmul.f32 %v4543_v36, %v1898_v19 }
 0xcb5   :  { %v1923_v40 = vmul.f32 %v3923_v35, %v1915_v37 }
 0xcb6   :  { %v1922_v41 = vmul.f32 %v3923_v35, %v1914_v38 }
 0xcb7   :  { %v5023_v43 = vadd.f32 %v3924_v39, %v1923_v40 }
 0xcb8   :  { %v5021_v42 = vadd.f32 %v3924_v39, %v1922_v41 }
 0xcba   :  { %4260 = vmatprep.mubr.msk.f32.mxu1 %vm107_vm0, %v5021_v42 }
 0xcbb   :  { %4261 = vmatmul.mubr.msk.f32.vlgmr.msra.gmra.mrb[22].mxu1 %vm107_vm0, %v5023_v43 }
 0xcbc   :  { %4265 = vmatprep.mubr.msk.f32.mxu1 %vm4590_vm1, %v4589_v22 }
 0xd8e   :  { %v4262_v45 = vpop.f32.mrb[22].mxu1 }
 0xd8f   :  { %v2017_v46 = vpop.f32.mrb[23].mxu1  ;;  %v5048_v48 = vadd.f32 %v4262_v45, %v3930_v44 }
 0xd90   :  { %v5034_v47 = vadd.f32 %v3930_v44, %v2017_v46 }
 0xd92   :  { %2193 = vrot.lane.b32.xlu0 %v5034_v47, %s4592_s21  ;;  %2027 = vrot.lane.b32.xlu1 %v5034_v47, %s4591_s4 }
 0xd96   :  { %2357 = vrot.lane.b32.xlu0 %v5034_v47, %s4594_s2  ;;  %2191 = vrot.lane.b32.xlu1 %v5034_v47, %s4593_s22 }
 0xd9a   :  { %2523 = vrot.lane.b32.xlu0 %v5034_v47, %s4595_s23  ;;  %2359 = vrot.lane.b32.xlu1 %v5034_v47, %s4596_s24 }
 0xd9e   :  { %2871 = vrot.lane.b32.xlu0 %v5048_v48, %s4592_s21  ;;  %2525 = vrot.lane.b32.xlu1 %v5034_v47, %s5344_s5  ;;  %s5346_s21 = smov 56  }
 0xda2   :  { %3037 = vrot.lane.b32.xlu0 %v5048_v48, %s4596_s24  ;;  %2705 = vrot.lane.b32.xlu1 %v5048_v48, %s4591_s4  ;;  %s5347_s4 = smov 40  }
 0xda6   :  { %3203 = vrot.lane.b32.xlu0 %v5048_v48, %s5344_s5  ;;  %2869 = vrot.lane.b32.xlu1 %v5048_v48, %s4593_s22  ;;  %s5348_s22 = smov 48  }
 0xdaa   :  { %2115 = vrot.lane.b32.xlu0 %v5034_v47, %s5345_s3  ;;  %3035 = vrot.lane.b32.xlu1 %v5048_v48, %s4594_s2  ;;  %s5349_s2 = smov 24  }
 0xdae   :  { %3201 = vrot.lane.b32.xlu1 %v5048_v48, %s4595_s23 }
 0xdb2   :  { %2281 = vrot.lane.b32.xlu1 %v5034_v47, %s5346_s21 }
 0xe04   :  { %v2194_v49 = vpop.permute.xlu0 %2193  ;;  %v2028_v50 = vpop.permute.xlu1 %2027 }
 0xe05   :  { %4264 = vmatpush3.xpose.msk.msra.mxu1 %vm192_vm2, %v2028_v50  ;;  %4274 = vmatpush3.xpose.msk.msra.mxu0 %vm192_vm2, %v2194_v49 }
 0xe06   :  { %4283 = vmatprep.subr.mxu0 %v4589_v22  ;;  %4268 = vmatprep.subr.mxu1 %v4589_v22 }
 0xe08   :  { %v2358_v51 = vpop.permute.xlu0 %2357  ;;  %4266 = vmatmul.mubr.msk.f32.vlgmr.msra.gmra.mrb[24].mxu1 %vm192_vm2, %v5034_v47  ;;  %v2192_v52 = vpop.permute.xlu1 %2191 }
 0xe09   :  { %4276 = vmatmul.mubr.msk.f32.vlgmr.msra.gmra.mrb[18].mxu0 %vm192_vm2, %v2192_v52  ;;  %4270 = vmatprep.mubr.msk.f32.mxu1 %vm4590_vm1, %v4589_v22 }
 0xe0a   :  { %4285 = vmatprep.mubr.msk.f32.mxu0 %vm4590_vm1, %v4589_v22 }
 0xe0c   :  { %v2524_v53 = vpop.permute.xlu0 %2523  ;;  %v2360_v54 = vpop.permute.xlu1 %2359 }
 0xe0d   :  { %4284 = vmatpush3.xpose.msk.msra.mxu0 %vm192_vm2, %v2360_v54 }
 0xe0e   :  { %4293 = vmatprep.subr.mxu0 %v4589_v22 }
 0xe10   :  { %v2872_v55 = vpop.permute.xlu0 %2871  ;;  %4286 = vmatmul.mubr.msk.f32.vlgmr.msra.gmra.mrb[20].mxu0 %vm192_vm2, %v2358_v51  ;;  %v2526_v56 = vpop.permute.xlu1 %2525 }
 0xe11   :  { %4294 = vmatpush3.xpose.msk.msra.mxu0 %vm192_vm2, %v2526_v56  ;;  %4295 = vmatprep.mubr.msk.f32.mxu0 %vm4590_vm1, %v4589_v22 }
 0xe12   :  { %4303 = vmatprep.subr.mxu0 %v4589_v22 }
 0xe14   :  { %v3038_v57 = vpop.permute.xlu0 %3037  ;;  %4296 = vmatmul.mubr.msk.f32.vlgmr.msra.gmra.mrb[22].mxu0 %vm192_vm2, %v2524_v53  ;;  %v2706_v59 = vpop.permute.xlu1 %2705 }
 0xe15   :  { %4304 = vmatpush3.xpose.msk.msra.mxu0 %vm192_vm2, %v2706_v59  ;;  %4305 = vmatprep.mubr.msk.f32.mxu0 %vm4590_vm1, %v4589_v22 }
 0xe16   :  { %4313 = vmatprep.subr.mxu0 %v4589_v22 }
 0xe18   :  { %v3204_v60 = vpop.permute.xlu0 %3203  ;;  %4306 = vmatmul.mubr.msk.f32.vlgmr.msra.gmra.mrb[24].mxu0 %vm192_vm2, %v5048_v48  ;;  %v2870_v61 = vpop.permute.xlu1 %2869 }
 0xe19   :  { %4314 = vmatpush3.xpose.msk.msra.mxu0 %vm192_vm2, %v2872_v55  ;;  %4315 = vmatprep.mubr.msk.f32.mxu0 %vm4590_vm1, %v4589_v22 }
 0xe1a   :  { %4323 = vmatprep.subr.mxu0 %v4589_v22 }
 0xe1c   :  { %v2116_v58 = vpop.permute.xlu0 %2115  ;;  %4316 = vmatmul.mubr.msk.f32.vlgmr.msra.gmra.mrb[26].mxu0 %vm192_vm2, %v2870_v61  ;;  %v3036_v62 = vpop.permute.xlu1 %3035 }
 0xe1d   :  { %4269 = vmatpush3.msra.mxu1 %v2116_v58  ;;  %4324 = vmatpush3.xpose.msk.msra.mxu0 %vm192_vm2, %v3038_v57 }
 0xe1e   :  { %4325 = vmatprep.mubr.msk.f32.mxu0 %vm4590_vm1, %v4589_v22  ;;  %4333 = vmatprep.subr.mxu0 %v4589_v22 }
 0xe1f   :  { %4278 = vmatprep.subr.mxu1 %v4589_v22 }
 0xe20   :  { %4326 = vmatmul.mubr.msk.f32.vlgmr.msra.gmra.mrb[28].mxu0 %vm192_vm2, %v3036_v62  ;;  %v3202_v63 = vpop.permute.xlu1 %3201 }
 0xe21   :  { %4334 = vmatpush3.xpose.msk.msra.mxu0 %vm192_vm2, %v3204_v60  ;;  %4335 = vmatprep.mubr.msk.f32.mxu0 %vm4590_vm1, %v4589_v22 }
 0xe24   :  { %4336 = vmatmul.mubr.msk.f32.vlgmr.msra.gmra.mrb[30].mxu0 %vm192_vm2, %v3202_v63  ;;  %v5122_v33 = vpop.permute.xlu1 %2281 }
 0xedb   :  { %v2099_v0 = vpop.f32.mrb[24].mxu1 }
 0xedc   :  { %v2103_v1 = vmul.f32 0.35355338, %v2099_v0  ;;  %v4267_v2 = vpop.f32.mrb[25].mxu1  ;;  %v2265_v3 = vpop.f32.mrb[18].mxu0 }
 0xedd   :  { %v2269_v4 = vmul.f32 0.35355338, %v2265_v3  ;;  %v4277_v5 = vpop.f32.mrb[19].mxu0 }
 0xede   :  { %v2104_v6 = vsel %vm192_vm2, %v2103_v1, -inf }
 0xedf   :  { %2105 = vmax.xlane.f32.xlu0 %v2104_v6  ;;  %v2270_v27 = vsel %vm192_vm2, %v2269_v4, -inf }
 0xee0   :  { %2271 = vmax.xlane.f32.xlu1 %v2270_v27 }
 0xee3   :  { %v2431_v7 = vpop.f32.mrb[20].mxu0 }
 0xee4   :  { %v2435_v8 = vmul.f32 0.35355338, %v2431_v7  ;;  %v4287_v25 = vpop.f32.mrb[21].mxu0 }
 0xee6   :  { %v2436_v9 = vsel %vm192_vm2, %v2435_v8, -inf }
 0xee7   :  { %2437 = vmax.xlane.f32.xlu0 %v2436_v9  ;;  %v2597_v10 = vpop.f32.mrb[22].mxu0 }
 0xee8   :  { %v2601_v11 = vmul.f32 0.35355338, %v2597_v10  ;;  %v4297_v12 = vpop.f32.mrb[23].mxu0 }
 0xeea   :  { %v2602_v21 = vsel %vm192_vm2, %v2601_v11, -inf }
 0xeeb   :  { %2603 = vmax.xlane.f32.xlu0 %v2602_v21  ;;  %v2777_v19 = vpop.f32.mrb[24].mxu0 }
 0xeec   :  { %v2781_v13 = vmul.f32 0.35355338, %v2777_v19  ;;  %v4307_v14 = vpop.f32.mrb[25].mxu0 }
 0xeee   :  { %v2782_v15 = vsel %vm192_vm2, %v2781_v13, -inf }
 0xeef   :  { %2783 = vmax.xlane.f32.xlu1 %v2782_v15  ;;  %v2943_v16 = vpop.f32.mrb[26].mxu0 }
 0xef0   :  { %v2947_v17 = vmul.f32 0.35355338, %v2943_v16  ;;  %v4317_v18 = vpop.f32.mrb[27].mxu0 }
 0xef2   :  { %v2948_v20 = vsel %vm192_vm2, %v2947_v17, -inf }
 0xef3   :  { %2949 = vmax.xlane.f32.xlu0 %v2948_v20  ;;  %v3109_v23 = vpop.f32.mrb[28].mxu0 }
 0xef4   :  { %v3113_v24 = vmul.f32 0.35355338, %v3109_v23  ;;  %v4327_v26 = vpop.f32.mrb[29].mxu0 }
 0xef6   :  { %v3114_v28 = vsel %vm192_vm2, %v3113_v24, -inf }
 0xef7   :  { %3115 = vmax.xlane.f32.xlu1 %v3114_v28  ;;  %v3275_v29 = vpop.f32.mrb[30].mxu0 }
 0xef8   :  { %v3279_v30 = vmul.f32 0.35355338, %v3275_v29  ;;  %v4337_v31 = vpop.f32.mrb[31].mxu0 }
 0xefa   :  { %v3280_v32 = vsel %vm192_vm2, %v3279_v30, -inf }
 0xefb   :  { %3281 = vmax.xlane.f32.xlu0 %v3280_v32 }
 0xf08   :  { %2613 = vrot.lane.b32.xlu1 %v5034_v47, %s5347_s4 }
 0xf11   :  { %2447 = vrot.lane.b32.xlu0 %v5034_v47, %s5348_s22 }
 0xf6c   :  { %v2106_v34 = vpop.xlane.xlu0 %2105 }
 0xf6d   :  { %v2107_v35 = vsub.f32 %v2103_v1, %v2106_v34  ;;  %v2272_v36 = vpop.xlane.xlu1 %2271 }
 0xf6e   :  { %v2273_v37 = vsub.f32 %v2269_v4, %v2272_v36 }
 0xf6f   :  { %v2108_v38 = vmul.f32 1.442695, %v2107_v35 }
 0xf70   :  { %v2274_v39 = vmul.f32 1.442695, %v2273_v37 }
 0xf71   :  { %4544 = vpow2.f32 %v2108_v38 }
 0xf72   :  { %4546 = vpow2.f32 %v2274_v39 }
 0xf74   :  { %v2438_v40 = vpop.xlane.xlu0 %2437 }
 0xf75   :  { %v2439_v41 = vsub.f32 %v2435_v8, %v2438_v40 }
 0xf77   :  { %v2440_v44 = vmul.f32 1.442695, %v2439_v41 }
 0xf78   :  { %v2604_v45 = vpop.xlane.xlu0 %2603 }
 0xf79   :  { %4548 = vpow2.f32 %v2440_v44  ;;  %v2605_v46 = vsub.f32 %v2601_v11, %v2604_v45 }
 0xf7b   :  { %v4545_v49 = vpop.eup %4544  ;;  %v2606_v50 = vmul.f32 1.442695, %v2605_v46 }
 0xf7c   :  { %v4547_v51 = vpop.eup %4546  ;;  %v2110_v47 = vsel %vm192_vm2, %v4545_v49, 0.0  ;;  %v2784_v57 = vpop.xlane.xlu1 %2783 }
 0xf7d   :  { %4550 = vpow2.f32 %v2606_v50  ;;  %2111 = vadd.xlane.f32.xlu1 %v2110_v47  ;;  %v2276_v52 = vsel %vm192_vm2, %v4547_v51, 0.0  ;;  %v2785_v59 = vsub.f32 %v2781_v13, %v2784_v57  ;;  %v3959_v57 = vld [vmem:[%s5311_s6 + $0x30] sm:$0xff] }
 0xf7e   :  { %2277 = vadd.xlane.f32.xlu0 %v2276_v52 }
 0xf7f   :  { %v2786_v62 = vmul.f32 1.442695, %v2785_v59  ;;  %v3960_v59 = vld [vmem:[%s5311_s6 + $0x38] sm:$0xff] }
 0xf80   :  { %v2950_v60 = vpop.xlane.xlu0 %2949 }
 0xf81   :  { %v2951_v58 = vsub.f32 %v2947_v17, %v2950_v60  ;;  %4552 = vpow2.f32 %v2786_v62  ;;  %v4447_v60 = vpack.c.bf16 %v3960_v59, %v3959_v57  ;;  %v3977_v59 = vld [vmem:[%s5316_s12 + $0x40] sm:$0xff] }
 0xf83   :  { %v4549_v53 = vpop.eup %4548  ;;  %v2952_v1 = vmul.f32 1.442695, %v2951_v58 }
 0xf84   :  { %v2442_v54 = vsel %vm192_vm2, %v4549_v53, 0.0  ;;  %v3116_v61 = vpop.xlane.xlu1 %3115 }
 0xf85   :  { %2443 = vadd.xlane.f32.xlu1 %v2442_v54  ;;  %v3117_v63 = vsub.f32 %v3113_v24, %v3116_v61  ;;  %4554 = vpow2.f32 %v2952_v1  ;;  %v3957_v54 = vld [vmem:[%s5311_s6 + $0x20] sm:$0xff] }
 0xf87   :  { %v5127_v55 = vpop.eup %4550  ;;  %v3118_v2 = vmul.f32 1.442695, %v3117_v63 }
 0xf88   :  { %v2608_v56 = vsel %vm192_vm2, %v5127_v55, 0.0  ;;  %v3282_v0 = vpop.xlane.xlu0 %3281  ;;  %v2614_v11 = vpop.permute.xlu1 %2613 }
 0xf89   :  { %2609 = vadd.xlane.f32.xlu0 %v2608_v56  ;;  %v3283_v3 = vsub.f32 %v3279_v30, %v3282_v0  ;;  %4556 = vpow2.f32 %v3118_v2 }
 0xf8b   :  { %v3284_v4 = vmul.f32 1.442695, %v3283_v3  ;;  %v4553_v5 = vpop.eup %4552 }
 0xf8c   :  { %v2788_v27 = vsel %vm192_vm2, %v4553_v5, 0.0  ;;  %v2448_v12 = vpop.permute.xlu0 %2447 }
 0xf8d   :  { %4558 = vpow2.f32 %v3284_v4 }
 0xf8f   :  { %v5135_v6 = vpop.eup %4554 }
 0xf90   :  { %v2954_v8 = vsel %vm192_vm2, %v5135_v6, 0.0 }
 0xf93   :  { %v5138_v7 = vpop.eup %4556 }
 0xf94   :  { %v3120_v25 = vsel %vm192_vm2, %v5138_v7, 0.0 }
 0xf96   :  { %2959 = vrot.lane.b32.xlu1 %v5048_v48, %s5346_s21 }
 0xf97   :  { %v5144_v9 = vpop.eup %4558 }
 0xf98   :  { %v3286_v10 = vsel %vm192_vm2, %v5144_v9, 0.0 }
 0xf9f   :  { %2793 = vrot.lane.b32.xlu0 %v5048_v48, %s5345_s3 }
 0xfba   :  { %2789 = vadd.xlane.f32.xlu1 %v2788_v27 }
 0xfbe   :  { %2955 = vadd.xlane.f32.xlu0 %v2954_v8  ;;  %3121 = vadd.xlane.f32.xlu1 %v3120_v25 }
 0xfc2   :  { %3287 = vadd.xlane.f32.xlu1 %v3286_v10 }
 0xfd3   :  { %3291 = vrot.lane.b32.xlu1 %v5048_v48, %s5347_s4 }
 0xfd4   :  { %3125 = vrot.lane.b32.xlu0 %v5048_v48, %s5348_s22 }
0x100a   :  { %v2112_v21 = vpop.xlane.xlu1 %2111 }
0x100b   :  { %4560 = vrcp.f32 %v2112_v21  ;;  %v2278_v19 = vpop.xlane.xlu0 %2277 }
0x100c   :  { %4562 = vrcp.f32 %v2278_v19  ;;  %v3962_v19 = vld [vmem:[%s5312_s7 + $0x1] ss:$0 sm:$0xff] }
0x1012   :  { %v2444_v13 = vpop.xlane.xlu1 %2443 }
0x1013   :  { %4564 = vrcp.f32 %v2444_v13 }
0x1015   :  { %v4561_v14 = vpop.eup %4560 }
0x1016   :  { %v2114_v15 = vmul.f32 %v4561_v14, %v4545_v49  ;;  %v2610_v16 = vpop.xlane.xlu0 %2609  ;;  %v4563_v17 = vpop.eup %4562 }
0x1017   :  { %4566 = vrcp.f32 %v2610_v16  ;;  %v2280_v48 = vmul.f32 %v4563_v17, %v4547_v51  ;;  %v2960_v28 = vpop.permute.xlu1 %2959 }
0x1018   :  { %4271 = vmatmul.mubr.msk.f32.vlgmr.msra.gmra.mrb[26].mxu1 %vm192_vm2, %v2114_v15 }
0x1019   :  { %4279 = vmatpush3.msra.mxu1 %v5122_v33  ;;  %4280 = vmatprep.mubr.msk.f32.mxu1 %vm4590_vm1, %v4589_v22 }
0x101a   :  { %4288 = vmatprep.subr.mxu1 %v4589_v22  ;;  %v2794_v26 = vpop.permute.xlu0 %2793 }
0x101c   :  { %4281 = vmatmul.mubr.msk.f32.vlgmr.msra.gmra.mrb[28].mxu1 %vm192_vm2, %v2280_v48 }
0x101d   :  { %v4565_v18 = vpop.eup %4564  ;;  %4289 = vmatpush3.msra.mxu1 %v2448_v12  ;;  %4290 = vmatprep.mubr.msk.f32.mxu1 %vm4590_vm1, %v4589_v22 }
0x101e   :  { %v2446_v20 = vmul.f32 %v4565_v18, %v4549_v53  ;;  %4298 = vmatprep.subr.mxu1 %v4589_v22 }
0x1020   :  { %4291 = vmatmul.mubr.msk.f32.vlgmr.msra.gmra.mrb[30].mxu1 %vm192_vm2, %v2446_v20 }
0x1021   :  { %v4567_v23 = vpop.eup %4566  ;;  %4299 = vmatpush3.msra.mxu1 %v2614_v11  ;;  %4300 = vmatprep.mubr.msk.f32.mxu1 %vm4590_vm1, %v4589_v22 }
0x1022   :  { %v2612_v24 = vmul.f32 %v4567_v23, %v5127_v55  ;;  %4308 = vmatprep.subr.mxu1 %v4589_v22  ;;  %v3958_v55 = vld [vmem:[%s5311_s6 + $0x28] sm:$0xff] }
0x1023   :  { %v4443_v56 = vpack.c.bf16 %v3958_v55, %v3957_v54 }
0x1024   :  { %4301 = vmatmul.mubr.msk.f32.vlgmr.msra.gmra.mrb[32].mxu1 %vm192_vm2, %v2612_v24 }
0x1025   :  { %4309 = vmatpush3.msra.mxu1 %v2794_v26  ;;  %4310 = vmatprep.mubr.msk.f32.mxu1 %vm4590_vm1, %v4589_v22 }
0x1026   :  { %4318 = vmatprep.subr.mxu1 %v4589_v22  ;;  %4444 = vmatprep.subr.bf16.mxu0 %v4443_v56 }
0x1027   :  { %4446 = vmatpush3.bf16.msra.mxu0 %v4443_v56 }
0x1028   :  { %4448 = vmatprep.subr.bf16.mxu0 %v4447_v60 }
0x102b   :  { %4450 = vmatpush3.bf16.msra.mxu0 %v4447_v60  ;;  %v3978_v60 = vld [vmem:[%s5316_s12 + $0x48] sm:$0xff] }
0x1047   :  { %v2790_v29 = vpop.xlane.xlu1 %2789 }
0x1048   :  { %4568 = vrcp.f32 %v2790_v29 }
0x104b   :  { %v2956_v30 = vpop.xlane.xlu0 %2955  ;;  %v3122_v31 = vpop.xlane.xlu1 %3121 }
0x104c   :  { %4570 = vrcp.f32 %v2956_v30 }
0x104d   :  { %4572 = vrcp.f32 %v3122_v31 }
0x104f   :  { %v3288_v32 = vpop.xlane.xlu1 %3287  ;;  %v3126_v38 = vpop.permute.xlu0 %3125 }
0x1050   :  { %4574 = vrcp.f32 %v3288_v32 }
0x1052   :  { %v4569_v33 = vpop.eup %4568 }
0x1053   :  { %v2792_v34 = vmul.f32 %v4569_v33, %v4553_v5  ;;  %v3292_v41 = vpop.permute.xlu1 %3291 }
0x1055   :  { %4311 = vmatmul.mubr.msk.f32.vlgmr.msra.gmra.mrb[34].mxu1 %vm192_vm2, %v2792_v34  ;;  %v3970_v34 = vld [vmem:[%s5313_s10 + $0x28] sm:$0xff] }
0x1056   :  { %v4571_v35 = vpop.eup %4570  ;;  %4319 = vmatpush3.msra.mxu1 %v2960_v28  ;;  %4320 = vmatprep.mubr.msk.f32.mxu1 %vm4590_vm1, %v4589_v22 }
0x1057   :  { %v2958_v36 = vmul.f32 %v4571_v35, %v5135_v6  ;;  %4328 = vmatprep.subr.mxu1 %v4589_v22  ;;  %v4573_v37 = vpop.eup %4572 }
0x1058   :  { %v3124_v39 = vmul.f32 %v4573_v37, %v5138_v7  ;;  %v3972_v37 = vld [vmem:[%s5313_s10 + $0x38] sm:$0xff] }
0x1059   :  { %4321 = vmatmul.mubr.msk.f32.vlgmr.msra.gmra.mrb[36].mxu1 %vm192_vm2, %v2958_v36  ;;  %v3971_v36 = vld [vmem:[%s5313_s10 + $0x30] sm:$0xff] }
0x105a   :  { %4329 = vmatpush3.msra.mxu1 %v3126_v38  ;;  %4330 = vmatprep.mubr.msk.f32.mxu1 %vm4590_vm1, %v4589_v22  ;;  %v4575_v40 = vpop.eup %4574  ;;  %v4455_v38 = vpack.c.bf16 %v3972_v37, %v3971_v36  ;;  %v4605_v37 = vmov 0.0|0.0  }
0x105b   :  { %4338 = vmatprep.subr.mxu1 %v4589_v22  ;;  %v3290_v44 = vmul.f32 %v4575_v40, %v5144_v9 }
0x105d   :  { %4331 = vmatmul.mubr.msk.f32.vlgmr.msra.gmra.mrb[38].mxu1 %vm192_vm2, %v3124_v39 }
0x105e   :  { %4339 = vmatpush3.msra.mxu1 %v3292_v41  ;;  %4340 = vmatprep.mubr.msk.f32.mxu1 %vm4590_vm1, %v4589_v22 }
0x1061   :  { %4341 = vmatmul.mubr.msk.f32.vlgmr.msra.gmra.mrb[40].mxu1 %vm192_vm2, %v3290_v44 }
0x10eb   :  { %v2187_v45 = vpop.f32.mrb[26].mxu1 }
0x10ec   :  { %v4272_v46 = vpop.f32.mrb[27].mxu1 }
0x10ef   :  { %v2353_v49 = vpop.f32.mrb[28].mxu1 }
0x10f0   :  { %2690 = vrot.lane.b32.xlu0 %v2353_v49, %s4602_s30  ;;  %v4282_v50 = vpop.f32.mrb[29].mxu1 }
0x10f1   :  { %v3967_v50 = vld [vmem:[%s5314_s8 + $0x1] ss:$0 sm:$0xff] }
0x10f3   :  { %v2519_v51 = vpop.f32.mrb[30].mxu1 }
0x10f4   :  { %2694 = vrot.lane.b32.xlu1 %v2519_v51, %s4603_s27  ;;  %v4292_v47 = vpop.f32.mrb[31].mxu1 }
0x10f5   :  { %v3968_v47 = vld [vmem:[%s5315_s9 + $0x1] ss:$0 sm:$0xff] }
0x10f7   :  { %v2685_v52 = vpop.f32.mrb[32].mxu1 }
0x10f8   :  { %2698 = vrot.lane.b32.xlu1 %v2685_v52, %s5349_s2  ;;  %v4302_v53 = vpop.f32.mrb[33].mxu1 }
0x1128   :  { %v2865_v61 = vpop.f32.mrb[34].mxu1 }
0x1129   :  { %v4312_v58 = vpop.f32.mrb[35].mxu1 }
0x112a   :  { %v3979_v58 = vld [vmem:[%s5316_s12 + $0x50] sm:$0xff] }
0x112c   :  { %v3031_v62 = vpop.f32.mrb[36].mxu1 }
0x112d   :  { %3368 = vrot.lane.b32.xlu0 %v3031_v62, %s4602_s30  ;;  %v4322_v63 = vpop.f32.mrb[37].mxu1  ;;  %v3980_v62 = vld [vmem:[%s5316_s12 + $0x58] sm:$0xff] }
0x112e   :  { %v3981_v63 = vld [vmem:[%s5316_s12 + $0x60] sm:$0xff] }
0x1130   :  { %v3197_v0 = vpop.f32.mrb[38].mxu1 }
0x1131   :  { %3372 = vrot.lane.b32.xlu0 %v3197_v0, %s4603_s27  ;;  %v4332_v1 = vpop.f32.mrb[39].mxu1  ;;  %v3982_v0 = vld [vmem:[%s5316_s12 + $0x68] sm:$0xff] }
0x1132   :  { %v4467_v1 = vpack.c.bf16 %v3982_v0, %v3981_v63 }
0x1134   :  { %v3363_v2 = vpop.f32.mrb[40].mxu1 }
0x1135   :  { %3376 = vrot.lane.b32.xlu1 %v3363_v2, %s5349_s2  ;;  %v4342_v3 = vpop.f32.mrb[41].mxu1  ;;  %v3983_v2 = vld [vmem:[%s5316_s12 + $0x70] sm:$0xff] }
0x1136   :  { %v3984_v3 = vld [vmem:[%s5316_s12 + $0x78] sm:$0xff] }
0x1162   :  { %v2691_v4 = vpop.permute.xlu0 %2690 }
0x1163   :  { %v2701_v6 = vsel %vm192_vm2, %v2187_v45, %v2691_v4  ;;  %v4471_v4 = vpack.c.bf16 %v3984_v3, %v3983_v2 }
0x1166   :  { %v2695_v5 = vpop.permute.xlu1 %2694 }
0x1167   :  { %v2702_v27 = vsel %vm866_vm3, %v2701_v6, %v2695_v5  ;;  %v3974_v5 = vld [vmem:[%s5317_s11 + $0x1] ss:$0 sm:$0xff] }
0x116a   :  { %v2699_v7 = vpop.permute.xlu1 %2698 }
0x116b   :  { %v2703_v8 = vsel %vm868_vm4, %v2702_v27, %v2699_v7 }
0x116c   :  { %4351 = vmatprep.mubr.msk.f32.mxu0 %vm107_vm0, %v2703_v8 }
0x119f   :  { %v3369_v25 = vpop.permute.xlu0 %3368 }
0x11a0   :  { %v3379_v10 = vsel %vm192_vm2, %v2865_v61, %v3369_v25  ;;  %v4459_v61 = vpack.c.bf16 %v3978_v60, %v3977_v59  ;;  %v3992_v59 = vld [vmem:[%s5320_s15 + $0x1] ss:$0 sm:$0xff] }
0x11a2   :  { %4460 = vmatprep.subr.bf16.mxu0 %v4459_v61 }
0x11a3   :  { %v3373_v9 = vpop.permute.xlu0 %3372 }
0x11a4   :  { %v3380_v11 = vsel %vm866_vm3, %v3379_v10, %v3373_v9 }
0x11a7   :  { %v3377_v12 = vpop.permute.xlu1 %3376 }
0x11a8   :  { %v3381_v21 = vsel %vm868_vm4, %v3380_v11, %v3377_v12 }
0x11a9   :  { %4352 = vmatmul.mubr.msk.f32.vlgmr.msra.gmra.mrb[32].mxu0 %vm107_vm0, %v3381_v21 }
0x11aa   :  { %4462 = vmatpush3.bf16.msra.mxu0 %v4459_v61 }
0x127c   :  { %v4353_v13 = vpop.f32.mrb[32].mxu0 }
0x127d   :  { %v3473_v14 = vadd.f32 %v4353_v13, %v3962_v19  ;;  %v3467_v15 = vpop.f32.mrb[33].mxu0 }
0x127e   :  { %v3468_v16 = vadd.f32 %v3962_v19, %v3467_v15 }
0x127f   :  { %v3477_v17 = vadd.f32 %v3473_v14, %v5023_v43 }
0x1280   :  { %v3476_v48 = vadd.f32 %v3468_v16, %v5021_v42  ;;  %v3969_v42 = vld [vmem:[%s5313_s10 + $0x20] sm:$0xff] }
0x1281   :  { %v3485_v18 = vsel %vm107_vm0, %v3477_v17, 0.0  ;;  %v4451_v35 = vpack.c.bf16 %v3970_v34, %v3969_v42  ;;  %v3986_v16 = vld [vmem:[%s5318_s13 + $0x1] ss:$0 sm:$0xff] }
0x1282   :  { %3486 = vadd.xlane.f32.xlu1 %v3485_v18  ;;  %v3482_v20 = vsel %vm107_vm0, %v3476_v48, 0.0 }
0x1283   :  { %3483 = vadd.xlane.f32.xlu0 %v3482_v20  ;;  %4452 = vmatprep.subr.bf16.mxu1 %v4451_v35 }
0x1284   :  { %4454 = vmatpush3.bf16.msra.mxu1 %v4451_v35 }
0x1285   :  { %4456 = vmatprep.subr.bf16.mxu1 %v4455_v38 }
0x1288   :  { %4458 = vmatpush3.bf16.msra.mxu1 %v4455_v38  ;;  %v3793_v38 = vld [vmem:[%s5321_s16] sm:$0xff] }
0x1289   :  { %4475 = vmatprep.subr.bf16.mxu1 %v4605_v37 }
0x130f   :  { %v3487_v23 = vpop.xlane.xlu1 %3486 }
0x1310   :  { %v3489_v24 = vmul.f32 0.03125, %v3487_v23  ;;  %v3484_v26 = vpop.xlane.xlu0 %3483 }
0x1311   :  { %v3488_v28 = vmul.f32 0.03125, %v3484_v26 }
0x1312   :  { %v3491_v29 = vsub.f32 %v3477_v17, %v3489_v24 }
0x1313   :  { %v3490_v30 = vsub.f32 %v3476_v48, %v3488_v28 }
0x1314   :  { %v3493_v33 = vmul.f32 %v3491_v29, %v3491_v29 }
0x1315   :  { %v3492_v31 = vmul.f32 %v3490_v30, %v3490_v30 }
0x1316   :  { %v3497_v43 = vsel %vm107_vm0, %v3493_v33, 0.0 }
0x1317   :  { %v3494_v32 = vsel %vm107_vm0, %v3492_v31, 0.0 }
0x1318   :  { %3495 = vadd.xlane.f32.xlu0 %v3494_v32 }
0x131c   :  { %3498 = vadd.xlane.f32.xlu0 %v3497_v43 }
0x13a5   :  { %v3496_v39 = vpop.xlane.xlu0 %3495 }
0x13a6   :  { %v3500_v40 = vmul.f32 0.03125, %v3496_v39  ;;  %v3794_v39 = vld [vmem:[%s5321_s16 + $0x8] sm:$0xff] }
0x13a8   :  { %v3502_v41 = vadd.f32 1e-12, %v3500_v40  ;;  %v3795_v40 = vld [vmem:[%s5321_s16 + $0x10] sm:$0xff] }
0x13a9   :  { %v3499_v44 = vpop.xlane.xlu0 %3498 }
0x13aa   :  { %4576 = vrsqrt.f32 %v3502_v41  ;;  %v3501_v45 = vmul.f32 0.03125, %v3499_v44  ;;  %v4476_v41 = vpack.c.bf16 %v3794_v39, %v3793_v38  ;;  %v3796_v44 = vld [vmem:[%s5321_s16 + $0x18] sm:$0xff] }
0x13ac   :  { %v3503_v46 = vadd.f32 1e-12, %v3501_v45  ;;  %v4479_v45 = vpack.c.bf16 %v3796_v44, %v3795_v40 }
0x13ae   :  { %4578 = vrsqrt.f32 %v3503_v46  ;;  %v23_v46 = vstv %s5322_s17 }
0x13af   :  { %24 = vst [vmem:[#allocation2] sm:$0x1] %v23_v46 }
0x13b4   :  { %v4577_v49 = vpop.eup %4576 }
0x13b5   :  { %v3506_v51 = vmul.f32 %v4577_v49, %v3490_v30 }
0x13b7   :  { %v3514_v52 = vmul.f32 %v3967_v50, %v3506_v51 }
0x13b8   :  { %v4579_v53 = vpop.eup %4578 }
0x13b9   :  { %v3507_v54 = vmul.f32 %v4579_v53, %v3491_v29  ;;  %v3522_v55 = vadd.f32 %v3968_v47, %v3514_v52 }
0x13bb   :  { %v3515_v56 = vmul.f32 %v3967_v50, %v3507_v54  ;;  %4362 = vmatprep.mubr.msk.f32.mxu1 %vm107_vm0, %v3522_v55 }
0x13bd   :  { %v3523_v57 = vadd.f32 %v3968_v47, %v3515_v56 }
0x13bf   :  { %4363 = vmatmul.mubr.msk.f32.vlgmr.msra.gmra.mrb[42].mxu1 %vm107_vm0, %v3523_v57 }
0x13c0   :  { %4392 = vmatprep.mubr.msk.f32.mxu1 %vm4590_vm1, %v4589_v22  ;;  %v4463_v22 = vpack.c.bf16 %v3980_v62, %v3979_v58  ;;  %4477 = vmatpush3.bf16.msra.mxu1 %v4476_v41 }
0x13c1   :  { %4478 = vmatprep.subr.bf16.mxu1 %v4605_v37 }
0x13c2   :  { %4464 = vmatprep.subr.bf16.mxu0 %v4463_v22 }
0x13c3   :  { %4466 = vmatpush3.bf16.msra.mxu0 %v4463_v22 }
0x13c4   :  { %4468 = vmatprep.subr.bf16.mxu0 %v4467_v1  ;;  %4480 = vmatpush3.bf16.msra.mxu1 %v4479_v45 }
0x13c7   :  { %4470 = vmatpush3.bf16.msra.mxu0 %v4467_v1 }
0x13c8   :  { %4472 = vmatprep.subr.bf16.mxu0 %v4471_v4 }
0x13cb   :  { %4474 = vmatpush3.bf16.msra.mxu0 %v4471_v4 }
0x1492   :  { %v4364_v6 = vpop.f32.mrb[42].mxu1 }
0x1493   :  { %v3615_v27 = vadd.f32 %v4364_v6, %v3974_v5  ;;  %v3609_v7 = vpop.f32.mrb[43].mxu1 }
0x1494   :  { %v3610_v8 = vadd.f32 %v3974_v5, %v3609_v7 }
0x1495   :  { %v3621_v25 = vmul.f32 0.70710677, %v3615_v27  ;;  %v3619_v13 = vmul.f32 0.5, %v3615_v27 }
0x1496   :  { %v3620_v9 = vmul.f32 0.70710677, %v3610_v8  ;;  %v3618_v21 = vmul.f32 0.5, %v3610_v8 }
0x1497   :  { %4580 = verf.f32 %v3621_v25 }
0x1498   :  { %4582 = verf.f32 %v3620_v9 }
0x14a1   :  { %v4581_v10 = vpop.eup %4580 }
0x14a2   :  { %v4583_v11 = vpop.eup %4582  ;;  %v3625_v12 = vadd.f32 1.0, %v4581_v10 }
0x14a3   :  { %v3624_v19 = vadd.f32 1.0, %v4583_v11 }
0x14a4   :  { %v3627_v15 = vmul.f32 %v3625_v12, %v3619_v13 }
0x14a5   :  { %v3626_v14 = vmul.f32 %v3624_v19, %v3618_v21  ;;  %v3993_v19 = vld [vmem:[#allocation2] ss:$0 sm:$0xff] }
0x14a7   :  { %4381 = vmatprep.mubr.msk.f32.mxu0 %vm1804_vm5, %v3626_v14 }
0x14a8   :  { %4382 = vmatmul.mubr.msk.f32.vlgmr.msra.gmra.mrb[34].mxu0 %vm1804_vm5, %v3627_v15 }
0x157b   :  { %v4383_v17 = vpop.f32.mrb[34].mxu0 }
0x157c   :  { %v3723_v48 = vadd.f32 %v4383_v17, %v3986_v16  ;;  %v3717_v18 = vpop.f32.mrb[35].mxu0 }
0x157d   :  { %v3718_v20 = vadd.f32 %v3986_v16, %v3717_v18 }
0x157e   :  { %v3727_v23 = vadd.f32 %v3723_v48, %v3523_v57 }
0x157f   :  { %v3726_v24 = vadd.f32 %v3718_v20, %v3522_v55  ;;  %v3991_v55 = vld [vmem:[%s5319_s14 + $0x1] ss:$0 sm:$0xff] }
0x1580   :  { %v3735_v26 = vsel %vm107_vm0, %v3727_v23, 0.0 }
0x1581   :  { %3736 = vadd.xlane.f32.xlu0 %v3735_v26  ;;  %v3732_v28 = vsel %vm107_vm0, %v3726_v24, 0.0 }
0x1582   :  { %3733 = vadd.xlane.f32.xlu1 %v3732_v28 }
0x160e   :  { %v3737_v29 = vpop.xlane.xlu0 %3736 }
0x160f   :  { %v3739_v30 = vmul.f32 0.03125, %v3737_v29  ;;  %v3734_v31 = vpop.xlane.xlu1 %3733 }
0x1610   :  { %v3738_v32 = vmul.f32 0.03125, %v3734_v31 }
0x1611   :  { %v3741_v33 = vsub.f32 %v3727_v23, %v3739_v30 }
0x1612   :  { %v3740_v43 = vsub.f32 %v3726_v24, %v3738_v32 }
0x1613   :  { %v3743_v42 = vmul.f32 %v3741_v33, %v3741_v33 }
0x1614   :  { %v3742_v34 = vmul.f32 %v3740_v43, %v3740_v43 }
0x1615   :  { %v3747_v35 = vsel %vm107_vm0, %v3743_v42, 0.0 }
0x1616   :  { %3748 = vadd.xlane.f32.xlu0 %v3747_v35  ;;  %v3744_v36 = vsel %vm107_vm0, %v3742_v34, 0.0 }
0x1617   :  { %3745 = vadd.xlane.f32.xlu1 %v3744_v36 }
0x16a3   :  { %v3749_v49 = vpop.xlane.xlu0 %3748 }
0x16a4   :  { %v3751_v50 = vmul.f32 0.03125, %v3749_v49  ;;  %v3746_v51 = vpop.xlane.xlu1 %3745 }
0x16a5   :  { %v3750_v47 = vmul.f32 0.03125, %v3746_v51 }
0x16a6   :  { %v3753_v52 = vadd.f32 1e-12, %v3751_v50 }
0x16a7   :  { %v3752_v53 = vadd.f32 1e-12, %v3750_v47 }
0x16a8   :  { %4584 = vrsqrt.f32 %v3753_v52 }
0x16a9   :  { %4586 = vrsqrt.f32 %v3752_v53 }
0x16b2   :  { %v4585_v54 = vpop.eup %4584 }
0x16b3   :  { %v4587_v56 = vpop.eup %4586  ;;  %v3757_v57 = vmul.f32 %v4585_v54, %v3741_v33 }
0x16b4   :  { %v3756_v60 = vmul.f32 %v4587_v56, %v3740_v43 }
0x16b5   :  { %v3765_v61 = vmul.f32 %v3991_v55, %v3757_v57 }
0x16b6   :  { %v3764_v58 = vmul.f32 %v3991_v55, %v3756_v60 }
0x16b7   :  { %v3773_v62 = vadd.f32 %v3992_v59, %v3765_v61 }
0x16b8   :  { %v3772_v22 = vadd.f32 %v3992_v59, %v3764_v58 }
0x16b9   :  { %v3783_v63 = vsel %vm107_vm0, %v3773_v62, 0.0 }
0x16ba   :  { %v3774_v0 = vsel %vm107_vm0, %v3772_v22, 0.0  ;;  %v3784_v1 = vrot.slane %v3783_v63, 4 }
0x16bb   :  { %v3775_v2 = vrot.slane %v3774_v0, 4 }
0x16bc   :  { %v3785_v3 = vadd.f32 %v3784_v1, %v3783_v63 }
0x16bd   :  { %v3776_v4 = vadd.f32 %v3775_v2, %v3774_v0 }
0x16be   :  { %v3786_v5 = vrot.slane %v3785_v3, 2 }
0x16bf   :  { %v3777_v6 = vrot.slane %v3776_v4, 2 }
0x16c0   :  { %v3787_v27 = vadd.f32 %v3786_v5, %v3785_v3 }
0x16c1   :  { %v3778_v7 = vadd.f32 %v3777_v6, %v3776_v4 }
0x16c2   :  { %v3788_v8 = vrot.slane %v3787_v27, 1 }
0x16c3   :  { %v3779_v25 = vrot.slane %v3778_v7, 1 }
0x16c4   :  { %v3789_v9 = vadd.f32 %v3788_v8, %v3787_v27 }
0x16c5   :  { %v3780_v10 = vadd.f32 %v3779_v25, %v3778_v7 }
0x16c6   :  { %v3790_v11 = vmul.f32 0.125, %v3789_v9 }
0x16c7   :  { %v3782_v12 = vmul.f32 0.125, %v3780_v10 }
0x16c9   :  { %v3792_v21 = vsel %vm3791_vm6, %v3782_v12, %v3790_v11 }
0x16ca   :  { %4393 = vmatmul.mubr.msk.f32.vlgmr.msra.gmra.mrb[44].mxu1 %vm107_vm0, %v3792_v21 }
0x179d   :  { %v3873_v13 = vpop.f32.mrb[44].mxu1 }
0x179e   :  { %v3874_v14 = vadd.f32 %v3993_v19, %v3873_v13  ;;  %v4394_v15 = vpop.f32.mrb[45].mxu1 }
0x17a0   :  { %3878 = vst.msk [vmem:[%s5323_s18] sm:$0x3] %vm3877_vm7, %v3874_v14 }

</bundles_post_ra>
